<compile_context>
chip_gen: v7x
topology: tpu7x:2x2x1
jax: 0.10.0
libtpu: 0.0.40
codegen_flags: <defaults>
</compile_context>

<pallas_src>
import functools

import jax
import jax.numpy as jnp
from jax import lax
from jax.experimental import pallas as pl
from jax.experimental.pallas import tpu as pltpu

LEAKY_SLOPE = 0.01
BN_EPS = 1e-5
_VMEM_LIMIT = 48 * 1024 * 1024  # explicit scoped-VMEM cap; safely below v7x's 64 MiB physical


def _round_up(x, m):
    return -(-x // m) * m


def _pick_tile(d, candidates=(512, 256, 128)):
    """Largest MXU-friendly tile dividing d.  Callers pad the row dim (M) to a
    multiple of 128 first, so the full-dim fallback only triggers for small
    channel dims (< 128), where full-extent is the only other legal minor block."""
    for c in candidates:
        if d % c == 0:
            return c
    return d


def _params(dims):
    return pltpu.CompilerParams(dimension_semantics=dims, vmem_limit_bytes=_VMEM_LIMIT)


# ----------------------------------------------------------------------------
# Kernel A: tiled matmul (bf16 -> f32 acc) + folded-BN affine (+ optional LeakyReLU)
# ----------------------------------------------------------------------------
def _matmul_bn_act_kernel(x_ref, w_ref, scale_ref, bias_ref, o_ref, acc_ref, *, apply_act):
    k = pl.program_id(2)

    @pl.when(k == 0)
    def _():
        acc_ref[...] = jnp.zeros_like(acc_ref)

    # bf16 x bf16 on the MXU, f32 accumulation.
    acc_ref[...] += jnp.dot(x_ref[...], w_ref[...], preferred_element_type=jnp.float32)

    @pl.when(k == pl.num_programs(2) - 1)
    def _():
        y = acc_ref[...] * scale_ref[...] + bias_ref[...]
        if apply_act:
            y = jnp.where(y >= 0, y, LEAKY_SLOPE * y)
        o_ref[...] = y.astype(o_ref.dtype)


def matmul_bn_act(x2d, w, scale, bias, *, apply_act, out_dtype=jnp.bfloat16):
    """(M,K)@(K,N) * scale + bias, optional LeakyReLU.  M padded to 128-multiple."""
    M, K = x2d.shape
    K2, N = w.shape
    assert K == K2
    Mp = _round_up(M, 128)
    if Mp != M:
        x2d = jnp.pad(x2d, ((0, Mp - M), (0, 0)))
    x2d = x2d.astype(jnp.bfloat16)
    w = w.astype(jnp.bfloat16)
    tm, tn, tk = _pick_tile(Mp), _pick_tile(N), _pick_tile(K)
    grid = (Mp // tm, N // tn, K // tk)
    kernel = functools.partial(_matmul_bn_act_kernel, apply_act=apply_act)
    out = pl.pallas_call(
        kernel,
        out_shape=jax.ShapeDtypeStruct((Mp, N), out_dtype),
        grid=grid,
        in_specs=[
            pl.BlockSpec((tm, tk), lambda i, j, k: (i, k)),
            pl.BlockSpec((tk, tn), lambda i, j, k: (k, j)),
            pl.BlockSpec((1, tn), lambda i, j, k: (0, j)),   # resident across i/k
            pl.BlockSpec((1, tn), lambda i, j, k: (0, j)),
        ],
        out_specs=pl.BlockSpec((tm, tn), lambda i, j, k: (i, j)),
        # f32 scratch kept because the output is stored bf16 (can't accumulate there).
        scratch_shapes=[pltpu.VMEM((tm, tn), jnp.float32)],
        compiler_params=_params(("parallel", "parallel", "arbitrary")),
    )(x2d, w, scale.reshape(1, N).astype(jnp.float32), bias.reshape(1, N).astype(jnp.float32))
    return out[:M] if Mp != M else out


# ----------------------------------------------------------------------------
# Kernel B: 3x3 stride-s conv (pad=1) + BN + LeakyReLU
#           stride-phase decomposition + halo'd row tiling + f32 VMEM accumulator
# ----------------------------------------------------------------------------
def _conv3x3_bn_act_kernel(xt_ref, w_ref, scale_ref, bias_ref, o_ref, acc_ref,
                           *, stride, tho, wo):
    cin = w_ref.shape[2]
    tco = w_ref.shape[3]
    acc_ref[...] = jnp.zeros_like(acc_ref)
    for kh in range(3):
        for kw in range(3):
            phase = (kh % stride) * stride + (kw % stride)
            a, b = kh // stride, kw // stride
            # Contiguous window inside this stride phase (halo rows live in the tile).
            win = xt_ref[phase, 0, 0, a:a + tho, b:b + wo, :]          # (tho, wo, cin) bf16
            acc_ref[...] += jnp.dot(win.reshape(tho * wo, cin), w_ref[kh, kw],
                                    preferred_element_type=jnp.float32)
    y = acc_ref[...] * scale_ref[...] + bias_ref[...]
    y = jnp.where(y >= 0, y, LEAKY_SLOPE * y)
    o_ref[...] = y.reshape(1, tho, wo, tco).astype(o_ref.dtype)


def conv3x3_bn_act(x_nhwc, w_hwio, scale, bias, stride, *, out_dtype=jnp.bfloat16, row_tile=8):
    n, h, w, c = x_nhwc.shape
    cout = w_hwio.shape[3]
    assert stride in (1, 2), "stride-phase decomposition validated for stride in {1, 2}"
    ho = (h - 1) // stride + 1
    wo = (w - 1) // stride + 1
    A = 2 // stride + 1                                   # distinct row/col offsets per phase
    hq = max(ho + A - 1, -(-(h + 2) // stride))
    wq = max(wo + A - 1, -(-(w + 2) // stride))

    x_nhwc = x_nhwc.astype(jnp.bfloat16)
    w_hwio = w_hwio.astype(jnp.bfloat16)

    # pad=1 (plus harmless extra zeros so H,W are multiples of stride), split into
    # stride phases so every tap is a contiguous window inside the kernel.
    xp = jnp.pad(x_nhwc, ((0, 0), (1, hq * stride - h - 1), (1, wq * stride - w - 1), (0, 0)))
    xph = xp.reshape(n, hq, stride, wq, stride, c).transpose(2, 4, 0, 1, 3, 5)
    xph = xph.reshape(stride * stride, n, hq, wq, c)

    # Row tiling with a duplicated halo (A-1 rows) so grid blocks never overlap.
    tho = min(ho, row_tile)
    n_hblk = -(-ho // tho)
    th_in = tho + A - 1
    rows = jnp.arange(n_hblk)[:, None] * tho + jnp.arange(th_in)[None, :]
    rows = jnp.minimum(rows.reshape(-1), hq - 1)
    xt = jnp.take(xph, rows, axis=2).reshape(stride * stride, n, n_hblk, th_in, wq, c)

    tco = _pick_tile(cout)
    kernel = functools.partial(_conv3x3_bn_act_kernel, stride=stride, tho=tho, wo=wo)
    out = pl.pallas_call(
        kernel,
        out_shape=jax.ShapeDtypeStruct((n, n_hblk * tho, wo, cout), out_dtype),
        grid=(n, cout // tco, n_hblk),            # row axis fastest -> weights stay resident
        in_specs=[
            pl.BlockSpec((stride * stride, 1, 1, th_in, wq, c),
                         lambda b, j, r: (0, b, r, 0, 0, 0)),
            pl.BlockSpec((3, 3, c, tco), lambda b, j, r: (0, 0, 0, j)),
            pl.BlockSpec((1, tco), lambda b, j, r: (0, j)),
            pl.BlockSpec((1, tco), lambda b, j, r: (0, j)),
        ],
        out_specs=pl.BlockSpec((1, tho, wo, tco), lambda b, j, r: (b, r, 0, j)),
        scratch_shapes=[pltpu.VMEM((tho * wo, tco), jnp.float32)],
        compiler_params=_params(("parallel", "parallel", "parallel")),
    )(xt, w_hwio, scale.reshape(1, cout).astype(jnp.float32),
      bias.reshape(1, cout).astype(jnp.float32))
    return out[:, :ho], ho, wo


# ----------------------------------------------------------------------------
# Kernel C: fused conv3(1x1)+BN3 + shortcut(1x1 conv+BN or identity) + add + LReLU
# ----------------------------------------------------------------------------
def _fused_out_proj_kernel(y_ref, xs_ref, w3_ref, s3_ref, b3_ref,
                           wsc_ref, ssc_ref, bsc_ref, o_ref):
    res = jnp.dot(y_ref[...], w3_ref[...], preferred_element_type=jnp.float32)
    res = res * s3_ref[...] + b3_ref[...]
    sc = jnp.dot(xs_ref[...], wsc_ref[...], preferred_element_type=jnp.float32)
    sc = sc * ssc_ref[...] + bsc_ref[...]
    z = res + sc
    o_ref[...] = jnp.where(z >= 0, z, LEAKY_SLOPE * z).astype(o_ref.dtype)


def _fused_out_id_kernel(y_ref, x_ref, w3_ref, s3_ref, b3_ref, o_ref):
    res = jnp.dot(y_ref[...], w3_ref[...], preferred_element_type=jnp.float32)
    z = res * s3_ref[...] + b3_ref[...] + x_ref[...].astype(jnp.float32)
    o_ref[...] = jnp.where(z >= 0, z, LEAKY_SLOPE * z).astype(o_ref.dtype)


def fused_out_proj(y2d, xs2d, w3, s3, b3, wsc, ssc, bsc):
    M, K3 = y2d.shape
    M2, Ksc = xs2d.shape
    assert M == M2
    N = w3.shape[1]
    Mp = _round_up(M, 128)
    if Mp != M:
        y2d = jnp.pad(y2d, ((0, Mp - M), (0, 0)))
        xs2d = jnp.pad(xs2d, ((0, Mp - M), (0, 0)))
    y2d = y2d.astype(jnp.bfloat16)
    xs2d = xs2d.astype(jnp.bfloat16)
    w3 = w3.astype(jnp.bfloat16)
    wsc = wsc.astype(jnp.bfloat16)
    tm, tn = _pick_tile(Mp), _pick_tile(N)
    gm, gn = Mp // tm, N // tn
    # HBM-traffic model: keep whichever side (activation row-blocks vs weight
    # column-blocks) is cheaper to hold resident across the inner grid axis.
    ktot = K3 + Ksc
    act_resident = Mp * ktot + gm * N * ktot <= N * ktot + gn * Mp * ktot
    if act_resident:
        grid = (gm, gn)
        IM = lambda f: (lambda i, j: f(i, j))
    else:
        grid = (gn, gm)
        IM = lambda f: (lambda j, i: f(i, j))
    out = pl.pallas_call(
        _fused_out_proj_kernel,
        out_shape=jax.ShapeDtypeStruct((Mp, N), jnp.float32),
        grid=grid,
        in_specs=[
            pl.BlockSpec((tm, K3), IM(lambda i, j: (i, 0))),
            pl.BlockSpec((tm, Ksc), IM(lambda i, j: (i, 0))),
            pl.BlockSpec((K3, tn), IM(lambda i, j: (0, j))),
            pl.BlockSpec((1, tn), IM(lambda i, j: (0, j))),
            pl.BlockSpec((1, tn), IM(lambda i, j: (0, j))),
            pl.BlockSpec((Ksc, tn), IM(lambda i, j: (0, j))),
            pl.BlockSpec((1, tn), IM(lambda i, j: (0, j))),
            pl.BlockSpec((1, tn), IM(lambda i, j: (0, j))),
        ],
        out_specs=pl.BlockSpec((tm, tn), IM(lambda i, j: (i, j))),
        compiler_params=_params(("parallel", "parallel")),
    )(y2d, xs2d, w3,
      s3.reshape(1, N).astype(jnp.float32), b3.reshape(1, N).astype(jnp.float32),
      wsc, ssc.reshape(1, N).astype(jnp.float32), bsc.reshape(1, N).astype(jnp.float32))
    return out[:M] if Mp != M else out


def fused_out_identity(y2d, x2d, w3, s3, b3):
    M, K3 = y2d.shape
    N = w3.shape[1]
    Mp = _round_up(M, 128)
    if Mp != M:
        y2d = jnp.pad(y2d, ((0, Mp - M), (0, 0)))
        x2d = jnp.pad(x2d, ((0, Mp - M), (0, 0)))
    y2d = y2d.astype(jnp.bfloat16)
    x2d = x2d.astype(jnp.bfloat16)
    w3 = w3.astype(jnp.bfloat16)
    tm, tn = _pick_tile(Mp), _pick_tile(N)
    out = pl.pallas_call(
        _fused_out_id_kernel,
        out_shape=jax.ShapeDtypeStruct((Mp, N), jnp.float32),
        grid=(Mp // tm, N // tn),
        in_specs=[
            pl.BlockSpec((tm, K3), lambda i, j: (i, 0)),
            pl.BlockSpec((tm, tn), lambda i, j: (i, j)),
            pl.BlockSpec((K3, tn), lambda i, j: (0, j)),
            pl.BlockSpec((1, tn), lambda i, j: (0, j)),
            pl.BlockSpec((1, tn), lambda i, j: (0, j)),
        ],
        out_specs=pl.BlockSpec((tm, tn), lambda i, j: (i, j)),
        compiler_params=_params(("parallel", "parallel")),
    )(y2d, x2d, w3, s3.reshape(1, N).astype(jnp.float32), b3.reshape(1, N).astype(jnp.float32))
    return out[:M] if Mp != M else out


# ----------------------------------------------------------------------------
# Plain-JAX glue
# ----------------------------------------------------------------------------
def fold_bn(gamma, beta, mean, var):
    scale = gamma / jnp.sqrt(var + BN_EPS)
    bias = beta - mean * scale
    return scale, bias


def bottleneck_forward(x_nchw, params, stride, in_channels, out_channels, expansion=2):
    """Pallas implementation of BottleNeck.forward.  Input/output are NCHW (PyTorch)."""
    n, cin, h, w = x_nchw.shape
    cexp = out_channels * expansion
    x = jnp.transpose(x_nchw, (0, 2, 3, 1))          # NCHW -> NHWC at module boundary

    # conv1 (1x1) -> BN -> LeakyReLU   (bf16 output feeds conv2 directly)
    s1, b1 = fold_bn(*params["bn1"])
    y1 = matmul_bn_act(x.reshape(n * h * w, cin), params["w1"], s1, b1, apply_act=True)
    y1 = y1.reshape(n, h, w, out_channels)

    # conv2 (3x3, stride, pad=1) -> BN -> LeakyReLU (no im2col materialization)
    s2, b2 = fold_bn(*params["bn2"])
    y2, ho, wo = conv3x3_bn_act(y1, params["w2"], s2, b2, stride)
    y2d = y2.reshape(n * ho * wo, out_channels)

    # conv3 (1x1) -> BN3 fused with shortcut branch, residual add and final LeakyReLU
    s3, b3 = fold_bn(*params["bn3"])
    if stride != 1 or cin != cexp:
        ssc, bsc = fold_bn(*params["bn_sc"])
        # stride-s 1x1 conv == spatial subsample then matmul (cheap XLA slice).
        xs = x[:, ::stride, ::stride, :].reshape(n * ho * wo, cin)
        out2d = fused_out_proj(y2d, xs, params["w3"], s3, b3, params["w_sc"], ssc, bsc)
    else:
        out2d = fused_out_identity(y2d, x.reshape(n * ho * wo, cexp), params["w3"], s3, b3)

    out = out2d.reshape(n, ho, wo, cexp)
    return jnp.transpose(out, (0, 3, 1, 2))


# ----------------------------------------------------------------------------
# Pure-JAX f32 reference (for correctness check)
# ----------------------------------------------------------------------------
def _lrelu(x):
    return jnp.where(x >= 0, x, LEAKY_SLOPE * x)


def _bn(x_nhwc, gamma, beta, mean, var):
    return (x_nhwc - mean) / jnp.sqrt(var + BN_EPS) * gamma + beta


def reference_forward(x_nchw, params, stride, in_channels, out_channels, expansion=2):
    dn = ("NHWC", "HWIO", "NHWC")
    x = jnp.transpose(x_nchw, (0, 2, 3, 1))
    cexp = out_channels * expansion

    y = lax.conv_general_dilated(x, params["w1"].reshape(1, 1, in_channels, out_channels),
                                 (1, 1), "VALID", dimension_numbers=dn)
    y = _lrelu(_bn(y, *params["bn1"]))
    y = lax.conv_general_dilated(y, params["w2"], (stride, stride),
                                 [(1, 1), (1, 1)], dimension_numbers=dn)
    y = _lrelu(_bn(y, *params["bn2"]))
    y = lax.conv_general_dilated(y, params["w3"].reshape(1, 1, out_channels, cexp),
                                 (1, 1), "VALID", dimension_numbers=dn)
    y = _bn(y, *params["bn3"])

    if stride != 1 or in_channels != cexp:
        sc = lax.conv_general_dilated(x, params["w_sc"].reshape(1, 1, in_channels, cexp),
                                      (stride, stride), "VALID", dimension_numbers=dn)
        sc = _bn(sc, *params["bn_sc"])
    else:
        sc = x
    out = _lrelu(y + sc)
    return jnp.transpose(out, (0, 3, 1, 2))


# ----------------------------------------------------------------------------
def make_params(key, in_channels, out_channels, expansion=2):
    cexp = out_channels * expansion
    ks = jax.random.split(key, 8)

    def bn_params(k, c):
        k1, k2, k3 = jax.random.split(k, 3)
        gamma = 1.0 + 0.1 * jax.random.normal(k1, (c,), jnp.float32)
        beta = 0.1 * jax.random.normal(k2, (c,), jnp.float32)
        mean = 0.1 * jax.random.normal(k3, (c,), jnp.float32)
        var = jnp.full((c,), 1.0, jnp.float32)
        return (gamma, beta, mean, var)

    return {
        # conv weights channels-last: 1x1 as (Cin, Cout), 3x3 as (kh, kw, Cin, Cout)
        "w1": 0.2 * jax.random.normal(ks[0], (in_channels, out_channels), jnp.float32),
        "bn1": bn_params(ks[1], out_channels),
        "w2": 0.2 * jax.random.normal(ks[2], (3, 3, out_channels, out_channels), jnp.float32),
        "bn2": bn_params(ks[3], out_channels),
        "w3": 0.2 * jax.random.normal(ks[4], (out_channels, cexp), jnp.float32),
        "bn3": bn_params(ks[5], cexp),
        "w_sc": 0.2 * jax.random.normal(ks[6], (in_channels, cexp), jnp.float32),
        "bn_sc": bn_params(ks[7], cexp),
    }


if __name__ == "__main__":
    key = jax.random.PRNGKey(0)
    kx1, kp1, kx2, kp2 = jax.random.split(key, 4)

    # bf16 MXU operands vs f32 XLA reference -> loosened tolerance.
    ATOL = RTOL = 5e-2

    # Case 1: projection shortcut (stride=2, in_channels != out_channels*expansion)
    in_c, out_c, stride = 4, 4, 2
    x = jax.random.normal(kx1, (2, in_c, 16, 16), jnp.float32)     # NCHW like PyTorch
    params = make_params(kp1, in_c, out_c)
    out = jax.block_until_ready(bottleneck_forward(x, params, stride, in_c, out_c))
    ref = reference_forward(x, params, stride, in_c, out_c)
    assert out.shape == (2, out_c * 2, 8, 8), out.shape
    assert jnp.allclose(out, ref, atol=ATOL, rtol=RTOL), float(jnp.max(jnp.abs(out - ref)))

    # Case 2: identity shortcut (stride=1, in_channels == out_channels*expansion)
    in_c2, out_c2, stride2 = 8, 4, 1
    x2 = jax.random.normal(kx2, (2, in_c2, 16, 16), jnp.float32)
    params2 = make_params(kp2, in_c2, out_c2)
    out2 = jax.block_until_ready(bottleneck_forward(x2, params2, stride2, in_c2, out_c2))
    ref2 = reference_forward(x2, params2, stride2, in_c2, out_c2)
    assert out2.shape == (2, out_c2 * 2, 16, 16), out2.shape
    assert jnp.allclose(out2, ref2, atol=ATOL, rtol=RTOL), float(jnp.max(jnp.abs(out2 - ref2)))

    print("KERNEL_OK")
</pallas_src>

<mosaic_0001>
module attributes {stable_mosaic.version = 11 : i64} {
  func.func @_matmul_bn_act_kernel(%arg0: i32, %arg1: i32, %arg2: i32, %arg3: memref<512x4xbf16, #tpu.memory_space<vmem>>, %arg4: memref<4x4xbf16, #tpu.memory_space<vmem>>, %arg5: memref<1x4xf32, #tpu.memory_space<vmem>>, %arg6: memref<1x4xf32, #tpu.memory_space<vmem>>, %arg7: memref<512x4xbf16, #tpu.memory_space<vmem>>, %arg8: memref<512x4xf32, #tpu.memory_space<vmem>>) attributes {dimension_semantics = [#tpu.dimension_semantics<parallel>, #tpu.dimension_semantics<parallel>, #tpu.dimension_semantics<arbitrary>], iteration_bounds = array<i64: 1, 1, 1>, scalar_prefetch = 0 : i64, scratch_operands = 1 : i64, tpu.core_type = #tpu.core_type<tc>, window_params = [{transform_indices = @transform_0, window_bounds = array<i64: 512, 4>}, {transform_indices = @transform_1, window_bounds = array<i64: 4, 4>}, {transform_indices = @transform_2, window_bounds = array<i64: 1, 4>}, {transform_indices = @transform_3, window_bounds = array<i64: 1, 4>}, {transform_indices = @transform_4, window_bounds = array<i64: 512, 4>}]} {
    %c0_i32 = arith.constant 0 : i32
    %0 = arith.cmpi eq, %arg2, %c0_i32 : i32
    %1 = arith.extui %0 : i1 to i32
    %c0_i32_0 = arith.constant 0 : i32
    %2 = arith.cmpi ne, %1, %c0_i32_0 : i32
    scf.if %2 {
      %cst_10 = arith.constant 0.000000e+00 : f32
      %12 = vector.broadcast %cst_10 : f32 to vector<512x4xf32>
      %c0_11 = arith.constant 0 : index
      %c0_12 = arith.constant 0 : index
      %13 = vector.load %arg8[%c0_11, %c0_12] : memref<512x4xf32, #tpu.memory_space<vmem>>, vector<512x4xf32>
      tpu.vector_store %arg8[%c0_11, %c0_12], %12 {strides = array<i32>} : memref<512x4xf32, #tpu.memory_space<vmem>>, vector<512x4xf32>,
    } else {
    }
    %c0 = arith.constant 0 : index
    %c0_1 = arith.constant 0 : index
    %3 = vector.load %arg8[%c0, %c0_1] : memref<512x4xf32, #tpu.memory_space<vmem>>, vector<512x4xf32>
    %c0_2 = arith.constant 0 : index
    %c0_3 = arith.constant 0 : index
    %4 = vector.load %arg3[%c0_2, %c0_3] : memref<512x4xbf16, #tpu.memory_space<vmem>>, vector<512x4xbf16>
    %c0_4 = arith.constant 0 : index
    %c0_5 = arith.constant 0 : index
    %5 = vector.load %arg4[%c0_4, %c0_5] : memref<4x4xbf16, #tpu.memory_space<vmem>>, vector<4x4xbf16>
    %cst = arith.constant dense<0.000000e+00> : vector<512x4xf32>
    %6 = tpu.matmul %4, %5, %cst {dimension_numbers = #tpu.dot_dimension_numbers<[1], [0], [0], [1], [0, 0, 1, 1], [], []>} : vector<512x4xbf16>, vector<4x4xbf16>, vector<512x4xf32> -> vector<512x4xf32>
    %7 = arith.addf %3, %6 : vector<512x4xf32>
    %c0_6 = arith.constant 0 : index
    %c0_7 = arith.constant 0 : index
    %8 = vector.load %arg8[%c0_6, %c0_7] : memref<512x4xf32, #tpu.memory_space<vmem>>, vector<512x4xf32>
    tpu.vector_store %arg8[%c0_6, %c0_7], %7 {strides = array<i32>} : memref<512x4xf32, #tpu.memory_space<vmem>>, vector<512x4xf32>,
    %c0_i32_8 = arith.constant 0 : i32
    %9 = arith.cmpi eq, %arg2, %c0_i32_8 : i32
    %10 = arith.extui %9 : i1 to i32
    %c0_i32_9 = arith.constant 0 : i32
    %11 = arith.cmpi ne, %10, %c0_i32_9 : i32
    scf.if %11 {
      %c0_10 = arith.constant 0 : index
      %c0_11 = arith.constant 0 : index
      %12 = vector.load %arg8[%c0_10, %c0_11] : memref<512x4xf32, #tpu.memory_space<vmem>>, vector<512x4xf32>
      %c0_12 = arith.constant 0 : index
      %c0_13 = arith.constant 0 : index
      %13 = vector.load %arg5[%c0_12, %c0_13] : memref<1x4xf32, #tpu.memory_space<vmem>>, vector<1x4xf32>
      %14 = vector.broadcast %13 : vector<1x4xf32> to vector<512x4xf32>
      %15 = arith.mulf %12, %14 : vector<512x4xf32>
      %c0_14 = arith.constant 0 : index
      %c0_15 = arith.constant 0 : index
      %16 = vector.load %arg6[%c0_14, %c0_15] : memref<1x4xf32, #tpu.memory_space<vmem>>, vector<1x4xf32>
      %17 = vector.broadcast %16 : vector<1x4xf32> to vector<512x4xf32>
      %18 = arith.addf %15, %17 : vector<512x4xf32>
      %cst_16 = arith.constant 0.000000e+00 : f32
      %19 = vector.broadcast %cst_16 : f32 to vector<512x4xf32>
      %20 = arith.cmpf oge, %18, %19 : vector<512x4xf32>
      %cst_17 = arith.constant 0.00999999977 : f32
      %21 = vector.broadcast %cst_17 : f32 to vector<512x4xf32>
      %22 = arith.mulf %21, %18 : vector<512x4xf32>
      %23 = arith.select %20, %18, %22 : vector<512x4xi1>, vector<512x4xf32>
      %24 = arith.truncf %23 : vector<512x4xf32> to vector<512x4xbf16>
      %c0_18 = arith.constant 0 : index
      %c0_19 = arith.constant 0 : index
      %25 = vector.load %arg7[%c0_18, %c0_19] : memref<512x4xbf16, #tpu.memory_space<vmem>>, vector<512x4xbf16>
      tpu.vector_store %arg7[%c0_18, %c0_19], %24 {strides = array<i32>} : memref<512x4xbf16, #tpu.memory_space<vmem>>, vector<512x4xbf16>,
    } else {
    }
    return
  }
  func.func @transform_0(%arg0: i32, %arg1: i32, %arg2: i32) -> (i32, i32) {
    %c0_i32 = arith.constant 0 : i32
    return %arg0, %arg2 : i32, i32
  }
  func.func @transform_1(%arg0: i32, %arg1: i32, %arg2: i32) -> (i32, i32) {
    %c0_i32 = arith.constant 0 : i32
    return %arg2, %arg1 : i32, i32
  }
  func.func @transform_2(%arg0: i32, %arg1: i32, %arg2: i32) -> (i32, i32) {
    %c0_i32 = arith.constant 0 : i32
    %c0_i32_0 = arith.constant 0 : i32
    return %c0_i32, %arg1 : i32, i32
  }
  func.func @transform_3(%arg0: i32, %arg1: i32, %arg2: i32) -> (i32, i32) {
    %c0_i32 = arith.constant 0 : i32
    %c0_i32_0 = arith.constant 0 : i32
    return %c0_i32, %arg1 : i32, i32
  }
  func.func @transform_4(%arg0: i32, %arg1: i32, %arg2: i32) -> (i32, i32) {
    %c0_i32 = arith.constant 0 : i32
    return %arg0, %arg1 : i32, i32
  }
}

</mosaic_0001>

<bundles_post_ra>
// kernel: tpu_custom_call.1
= control target key start
LH: loop header
LB: loop body
LE: loop exit
PB: predicated region body
PF: predicated region fallthrough
CT: control target
= control target key end

     0   :  { %vm473_vm0 = vcmask 1041408   ;;  %vm22_vm1 = vcmask 31744   ;;  %v1952_v1 = vmov 0.0   ;;  %vm1551_vm2 = vcmask 27648   ;;  %s2833_s1 = inlined_call_operand.vmem [shape: bf16[4,4], index: 1, kind: input, shape index: {}]   ;;  %s2834_s0 = inlined_call_operand.vmem [shape: bf16[512,4], index: 0, kind: input, shape index: {}]   ;;  %s2835_s2 = inlined_call_operand.vmem [shape: f32[1,4], index: 2, kind: input, shape index: {}]   ;;  %s2836_s3 = inlined_call_operand.vmem [shape: f32[1,4], index: 3, kind: input, shape index: {}]   ;;  %s2837_s4 = inlined_call_operand.vmem [shape: bf16[512,4], index: 4, kind: output, shape index: {}]  }
   0x1   :  { %v1981_v0 = vld [vmem:[%s2833_s1] sm:$0x3]  ;;  %25 = vst.msk [vmem:[#allocation2 + $0x10] sm:$0xff] %vm22_vm1, %v1952_v1  ;;  %23 = vst.msk [vmem:[#allocation2] sm:$0xff] %vm22_vm1, %v1952_v1  ;;  %v1920_v5 = vld [vmem:[%s2834_s0 + $0x8] sm:$0xff]  }
   0x2   :  { %24 = vst.msk [vmem:[#allocation2 + $0x8] sm:$0xff] %vm22_vm1, %v1952_v1  ;;  %26 = vst.msk [vmem:[#allocation2 + $0x18] sm:$0xff] %vm22_vm1, %v1952_v1  ;;  %1915 = vmatprep.subr.msk.bf16.mxu0 %vm473_vm0, %v1981_v0  ;;  %1916 = vmatprep.subr.msk.bf16.mxu1 %vm473_vm0, %v1981_v0  ;;  %v475_v2 = vsel %vm473_vm0, %v1981_v0, 0  ;;  %v1918_v3 = vld [vmem:[%s2834_s0] sm:$0xff]   ;;  %v1921_v6 = vld [vmem:[%s2834_s0 + $0x88] sm:$0xff]  }
   0x3   :  { %27 = vst.msk [vmem:[#allocation2 + $0x20] sm:$0xff] %vm22_vm1, %v1952_v1  ;;  %28 = vst.msk [vmem:[#allocation2 + $0x28] sm:$0xff] %vm22_vm1, %v1952_v1  ;;  %1848 = vmatpush3.bf16.msra.mxu0 %v475_v2  ;;  %1914 = vmatpush3.bf16.msra.mxu1 %v475_v2  ;;  %v1919_v4 = vld [vmem:[%s2834_s0 + $0x80] sm:$0xff]   ;;  %v1922_v7 = vld [vmem:[%s2834_s0 + $0x10] sm:$0xff]  }
   0x4   :  { %29 = vst.msk [vmem:[#allocation2 + $0x30] sm:$0xff] %vm22_vm1, %v1952_v1  ;;  %30 = vst.msk [vmem:[#allocation2 + $0x38] sm:$0xff] %vm22_vm1, %v1952_v1  ;;  %1849 = vmatprep.mubr.msk.bf16.mxu0 %vm22_vm1, %v1918_v3  ;;  %1881 = vmatprep.mubr.msk.bf16.mxu1 %vm22_vm1, %v1919_v4  ;;  %v1923_v8 = vld [vmem:[%s2834_s0 + $0x90] sm:$0xff]   ;;  %v1924_v9 = vld [vmem:[%s2834_s0 + $0x18] sm:$0xff]  }
   0x5   :  { %31 = vst.msk [vmem:[#allocation2 + $0x40] sm:$0xff] %vm22_vm1, %v1952_v1  ;;  %32 = vst.msk [vmem:[#allocation2 + $0x48] sm:$0xff] %vm22_vm1, %v1952_v1  ;;  %v1925_v10 = vld [vmem:[%s2834_s0 + $0x98] sm:$0xff]   ;;  %v1926_v11 = vld [vmem:[%s2834_s0 + $0x20] sm:$0xff]  }
   0x6   :  { %33 = vst.msk [vmem:[#allocation2 + $0x50] sm:$0xff] %vm22_vm1, %v1952_v1  ;;  %34 = vst.msk [vmem:[#allocation2 + $0x58] sm:$0xff] %vm22_vm1, %v1952_v1  ;;  %1850 = vmatmul.mubr.msk.bf16.vlgmr.msra.gmra.mrb[0].mxu0 %vm22_vm1, %v1920_v5  ;;  %1882 = vmatmul.mubr.msk.bf16.vlgmr.msra.gmra.mrb[0].mxu1 %vm22_vm1, %v1921_v6  ;;  %v1927_v12 = vld [vmem:[%s2834_s0 + $0xa0] sm:$0xff]   ;;  %v1928_v13 = vld [vmem:[%s2834_s0 + $0x28] sm:$0xff]  }
   0x7   :  { %35 = vst.msk [vmem:[#allocation2 + $0x60] sm:$0xff] %vm22_vm1, %v1952_v1  ;;  %36 = vst.msk [vmem:[#allocation2 + $0x68] sm:$0xff] %vm22_vm1, %v1952_v1  ;;  %1853 = vmatprep.mubr.msk.bf16.mxu0 %vm22_vm1, %v1922_v7  ;;  %1885 = vmatprep.mubr.msk.bf16.mxu1 %vm22_vm1, %v1923_v8  ;;  %v1929_v14 = vld [vmem:[%s2834_s0 + $0xa8] sm:$0xff]   ;;  %v1930_v15 = vld [vmem:[%s2834_s0 + $0x30] sm:$0xff]  }
   0x8   :  { %37 = vst.msk [vmem:[#allocation2 + $0x70] sm:$0xff] %vm22_vm1, %v1952_v1  ;;  %38 = vst.msk [vmem:[#allocation2 + $0x78] sm:$0xff] %vm22_vm1, %v1952_v1  ;;  %v1931_v16 = vld [vmem:[%s2834_s0 + $0xb0] sm:$0xff]   ;;  %v1932_v17 = vld [vmem:[%s2834_s0 + $0x38] sm:$0xff]  }
   0x9   :  { %39 = vst.msk [vmem:[#allocation2 + $0x80] sm:$0xff] %vm22_vm1, %v1952_v1  ;;  %40 = vst.msk [vmem:[#allocation2 + $0x88] sm:$0xff] %vm22_vm1, %v1952_v1  ;;  %v1933_v18 = vld [vmem:[%s2834_s0 + $0xb8] sm:$0xff]   ;;  %v1934_v19 = vld [vmem:[%s2834_s0 + $0x40] sm:$0xff]  }
   0xa   :  { %41 = vst.msk [vmem:[#allocation2 + $0x90] sm:$0xff] %vm22_vm1, %v1952_v1  ;;  %42 = vst.msk [vmem:[#allocation2 + $0x98] sm:$0xff] %vm22_vm1, %v1952_v1  ;;  %v1935_v20 = vld [vmem:[%s2834_s0 + $0xc0] sm:$0xff]   ;;  %v1936_v21 = vld [vmem:[%s2834_s0 + $0x48] sm:$0xff]  }
   0xb   :  { %43 = vst.msk [vmem:[#allocation2 + $0xa0] sm:$0xff] %vm22_vm1, %v1952_v1  ;;  %44 = vst.msk [vmem:[#allocation2 + $0xa8] sm:$0xff] %vm22_vm1, %v1952_v1  ;;  %v1937_v22 = vld [vmem:[%s2834_s0 + $0xc8] sm:$0xff]   ;;  %v1938_v23 = vld [vmem:[%s2834_s0 + $0x50] sm:$0xff]  }
   0xc   :  { %45 = vst.msk [vmem:[#allocation2 + $0xb0] sm:$0xff] %vm22_vm1, %v1952_v1  ;;  %46 = vst.msk [vmem:[#allocation2 + $0xb8] sm:$0xff] %vm22_vm1, %v1952_v1  ;;  %v1939_v24 = vld [vmem:[%s2834_s0 + $0xd0] sm:$0xff]   ;;  %v1940_v25 = vld [vmem:[%s2834_s0 + $0x58] sm:$0xff]  }
   0xd   :  { %47 = vst.msk [vmem:[#allocation2 + $0xc0] sm:$0xff] %vm22_vm1, %v1952_v1  ;;  %48 = vst.msk [vmem:[#allocation2 + $0xc8] sm:$0xff] %vm22_vm1, %v1952_v1  ;;  %v1941_v26 = vld [vmem:[%s2834_s0 + $0xd8] sm:$0xff]   ;;  %v1942_v27 = vld [vmem:[%s2834_s0 + $0x60] sm:$0xff]  }
   0xe   :  { %49 = vst.msk [vmem:[#allocation2 + $0xd0] sm:$0xff] %vm22_vm1, %v1952_v1  ;;  %50 = vst.msk [vmem:[#allocation2 + $0xd8] sm:$0xff] %vm22_vm1, %v1952_v1  ;;  %1854 = vmatmul.mubr.msk.bf16.gmra.mrb[4].mxu0 %vm22_vm1, %v1924_v9  ;;  %1886 = vmatmul.mubr.msk.bf16.gmra.mrb[4].mxu1 %vm22_vm1, %v1925_v10  ;;  %v1943_v28 = vld [vmem:[%s2834_s0 + $0xe0] sm:$0xff]   ;;  %v1944_v29 = vld [vmem:[%s2834_s0 + $0x68] sm:$0xff]  }
   0xf   :  { %51 = vst.msk [vmem:[#allocation2 + $0xe0] sm:$0xff] %vm22_vm1, %v1952_v1  ;;  %52 = vst.msk [vmem:[#allocation2 + $0xe8] sm:$0xff] %vm22_vm1, %v1952_v1  ;;  %1857 = vmatprep.mubr.msk.bf16.mxu0 %vm22_vm1, %v1926_v11  ;;  %1889 = vmatprep.mubr.msk.bf16.mxu1 %vm22_vm1, %v1927_v12  ;;  %v1945_v30 = vld [vmem:[%s2834_s0 + $0xe8] sm:$0xff]   ;;  %v1946_v31 = vld [vmem:[%s2834_s0 + $0x70] sm:$0xff]  }
  0x10   :  { %53 = vst.msk [vmem:[#allocation2 + $0xf0] sm:$0xff] %vm22_vm1, %v1952_v1  ;;  %54 = vst.msk [vmem:[#allocation2 + $0xf8] sm:$0xff] %vm22_vm1, %v1952_v1  ;;  %v1947_v32 = vld [vmem:[%s2834_s0 + $0xf0] sm:$0xff]   ;;  %v1948_v33 = vld [vmem:[%s2834_s0 + $0x78] sm:$0xff]  }
  0x11   :  { %55 = vst.msk [vmem:[#allocation2 + $0x100] sm:$0xff] %vm22_vm1, %v1952_v1  ;;  %56 = vst.msk [vmem:[#allocation2 + $0x108] sm:$0xff] %vm22_vm1, %v1952_v1  ;;  %v1949_v34 = vld [vmem:[%s2834_s0 + $0xf8] sm:$0xff]   ;;  %v89_v35 = vld [vmem:[#allocation2 + $0x10] sm:$0xff] }
  0x12   :  { %57 = vst.msk [vmem:[#allocation2 + $0x110] sm:$0xff] %vm22_vm1, %v1952_v1  ;;  %58 = vst.msk [vmem:[#allocation2 + $0x118] sm:$0xff] %vm22_vm1, %v1952_v1  ;;  %v87_v37 = vld [vmem:[#allocation2] sm:$0xff]  ;;  %v90_v40 = vld [vmem:[#allocation2 + $0x18] sm:$0xff] }
  0x13   :  { %59 = vst.msk [vmem:[#allocation2 + $0x120] sm:$0xff] %vm22_vm1, %v1952_v1  ;;  %60 = vst.msk [vmem:[#allocation2 + $0x128] sm:$0xff] %vm22_vm1, %v1952_v1  ;;  %v88_v45 = vld [vmem:[#allocation2 + $0x8] sm:$0xff]  ;;  %v93_v59 = vld [vmem:[#allocation2 + $0x30] sm:$0xff] }
  0x14   :  { %61 = vst.msk [vmem:[#allocation2 + $0x130] sm:$0xff] %vm22_vm1, %v1952_v1  ;;  %62 = vst.msk [vmem:[#allocation2 + $0x138] sm:$0xff] %vm22_vm1, %v1952_v1  ;;  %v91_v61 = vld [vmem:[#allocation2 + $0x20] sm:$0xff]  ;;  %v92_v6 = vld [vmem:[#allocation2 + $0x28] sm:$0xff] }
  0x15   :  { %63 = vst.msk [vmem:[#allocation2 + $0x140] sm:$0xff] %vm22_vm1, %v1952_v1  ;;  %64 = vst.msk [vmem:[#allocation2 + $0x148] sm:$0xff] %vm22_vm1, %v1952_v1  ;;  %v2256_v62 = vld [vmem:[%s2835_s2] ss:$0 sm:$0xff] }
  0x16   :  { %65 = vst.msk [vmem:[#allocation2 + $0x150] sm:$0xff] %vm22_vm1, %v1952_v1  ;;  %66 = vst.msk [vmem:[#allocation2 + $0x158] sm:$0xff] %vm22_vm1, %v1952_v1  ;;  %1858 = vmatmul.mubr.msk.bf16.gmra.mrb[8].mxu0 %vm22_vm1, %v1928_v13  ;;  %1890 = vmatmul.mubr.msk.bf16.gmra.mrb[8].mxu1 %vm22_vm1, %v1929_v14  ;;  %v2261_v8 = vld [vmem:[%s2836_s3] ss:$0 sm:$0xff] }
  0x17   :  { %67 = vst.msk [vmem:[#allocation2 + $0x160] sm:$0xff] %vm22_vm1, %v1952_v1  ;;  %68 = vst.msk [vmem:[#allocation2 + $0x168] sm:$0xff] %vm22_vm1, %v1952_v1  ;;  %1861 = vmatprep.mubr.msk.bf16.mxu0 %vm22_vm1, %v1930_v15  ;;  %1893 = vmatprep.mubr.msk.bf16.mxu1 %vm22_vm1, %v1931_v16 }
  0x18   :  { %69 = vst.msk [vmem:[#allocation2 + $0x170] sm:$0xff] %vm22_vm1, %v1952_v1  ;;  %70 = vst.msk [vmem:[#allocation2 + $0x178] sm:$0xff] %vm22_vm1, %v1952_v1  ;;  %v119_v39 = vld [vmem:[#allocation2 + $0x100] sm:$0xff]  ;;  %v120_v50 = vld [vmem:[#allocation2 + $0x108] sm:$0xff] }
  0x19   :  { %71 = vst.msk [vmem:[#allocation2 + $0x180] sm:$0xff] %vm22_vm1, %v1952_v1  ;;  %72 = vst.msk [vmem:[#allocation2 + $0x188] sm:$0xff] %vm22_vm1, %v1952_v1  ;;  %v121_v36 = vld [vmem:[#allocation2 + $0x110] sm:$0xff]  ;;  %v122_v44 = vld [vmem:[#allocation2 + $0x118] sm:$0xff] }
  0x1a   :  { %73 = vst.msk [vmem:[#allocation2 + $0x190] sm:$0xff] %vm22_vm1, %v1952_v1  ;;  %74 = vst.msk [vmem:[#allocation2 + $0x198] sm:$0xff] %vm22_vm1, %v1952_v1  ;;  %v123_v0 = vld [vmem:[#allocation2 + $0x120] sm:$0xff]  ;;  %v124_v13 = vld [vmem:[#allocation2 + $0x128] sm:$0xff] }
  0x1b   :  { %75 = vst.msk [vmem:[#allocation2 + $0x1a0] sm:$0xff] %vm22_vm1, %v1952_v1  ;;  %76 = vst.msk [vmem:[#allocation2 + $0x1a8] sm:$0xff] %vm22_vm1, %v1952_v1  ;;  %v125_v60 = vld [vmem:[#allocation2 + $0x130] sm:$0xff]  ;;  %v126_v5 = vld [vmem:[#allocation2 + $0x138] sm:$0xff] }
  0x1c   :  { %77 = vst.msk [vmem:[#allocation2 + $0x1b0] sm:$0xff] %vm22_vm1, %v1952_v1  ;;  %78 = vst.msk [vmem:[#allocation2 + $0x1b8] sm:$0xff] %vm22_vm1, %v1952_v1 }
  0x1d   :  { %79 = vst.msk [vmem:[#allocation2 + $0x1c0] sm:$0xff] %vm22_vm1, %v1952_v1  ;;  %80 = vst.msk [vmem:[#allocation2 + $0x1c8] sm:$0xff] %vm22_vm1, %v1952_v1 }
  0x1e   :  { %81 = vst.msk [vmem:[#allocation2 + $0x1d0] sm:$0xff] %vm22_vm1, %v1952_v1  ;;  %82 = vst.msk [vmem:[#allocation2 + $0x1d8] sm:$0xff] %vm22_vm1, %v1952_v1  ;;  %1862 = vmatmul.mubr.msk.bf16.gmra.mrb[12].mxu0 %vm22_vm1, %v1932_v17  ;;  %1894 = vmatmul.mubr.msk.bf16.gmra.mrb[12].mxu1 %vm22_vm1, %v1933_v18 }
  0x1f   :  { %83 = vst.msk [vmem:[#allocation2 + $0x1e0] sm:$0xff] %vm22_vm1, %v1952_v1  ;;  %84 = vst.msk [vmem:[#allocation2 + $0x1e8] sm:$0xff] %vm22_vm1, %v1952_v1  ;;  %1865 = vmatprep.mubr.msk.bf16.mxu0 %vm22_vm1, %v1934_v19  ;;  %1897 = vmatprep.mubr.msk.bf16.mxu1 %vm22_vm1, %v1935_v20 }
  0x20   :  { %85 = vst.msk [vmem:[#allocation2 + $0x1f0] sm:$0xff] %vm22_vm1, %v1952_v1  ;;  %86 = vst.msk [vmem:[#allocation2 + $0x1f8] sm:$0xff] %vm22_vm1, %v1952_v1  ;;  %v94_v1 = vld [vmem:[#allocation2 + $0x38] sm:$0xff] }
  0x26   :  { %1866 = vmatmul.mubr.msk.bf16.gmra.mrb[16].mxu0 %vm22_vm1, %v1936_v21  ;;  %1898 = vmatmul.mubr.msk.bf16.gmra.mrb[16].mxu1 %vm22_vm1, %v1937_v22 }
  0x27   :  { %1869 = vmatprep.mubr.msk.bf16.mxu0 %vm22_vm1, %v1938_v23  ;;  %1901 = vmatprep.mubr.msk.bf16.mxu1 %vm22_vm1, %v1939_v24 }
  0x2e   :  { %1870 = vmatmul.mubr.msk.bf16.gmra.mrb[20].mxu0 %vm22_vm1, %v1940_v25  ;;  %1902 = vmatmul.mubr.msk.bf16.gmra.mrb[20].mxu1 %vm22_vm1, %v1941_v26 }
  0x2f   :  { %1873 = vmatprep.mubr.msk.bf16.mxu0 %vm22_vm1, %v1942_v27  ;;  %1905 = vmatprep.mubr.msk.bf16.mxu1 %vm22_vm1, %v1943_v28 }
  0x36   :  { %1874 = vmatmul.mubr.msk.bf16.gmra.mrb[24].mxu0 %vm22_vm1, %v1944_v29  ;;  %1906 = vmatmul.mubr.msk.bf16.gmra.mrb[24].mxu1 %vm22_vm1, %v1945_v30 }
  0x37   :  { %1877 = vmatprep.mubr.msk.bf16.mxu0 %vm22_vm1, %v1946_v31  ;;  %1909 = vmatprep.mubr.msk.bf16.mxu1 %vm22_vm1, %v1947_v32 }
  0x3e   :  { %1878 = vmatmul.mubr.msk.bf16.gmra.mrb[28].mxu0 %vm22_vm1, %v1948_v33  ;;  %1910 = vmatmul.mubr.msk.bf16.gmra.mrb[28].mxu1 %vm22_vm1, %v1949_v34 }
  0xd9   :  { %v1851_v38 = vpop.f32.mrb[0].mxu0  ;;  %v1883_v42 = vpop.f32.mrb[0].mxu1 }
  0xda   :  { %v768_v41 = vadd.f32 %v1851_v38, %v89_v35  ;;  %v511_v43 = vpop.f32.mrb[1].mxu0  ;;  %v800_v46 = vadd.f32 %v1883_v42, %v121_v36  ;;  %v639_v48 = vpop.f32.mrb[1].mxu1 }
  0xdb   :  { %v766_v47 = vadd.f32 %v511_v43, %v87_v37  ;;  %v1852_v49 = vpop.f32.mrb[2].mxu0  ;;  %v798_v51 = vadd.f32 %v639_v48, %v119_v39  ;;  %v1884_v53 = vpop.f32.mrb[2].mxu1 }
  0xdc   :  { %832 = vst.msk [vmem:[#allocation2 + $0x10] sm:$0xff] %vm22_vm1, %v768_v41  ;;  %v769_v52 = vadd.f32 %v1852_v49, %v90_v40  ;;  %v514_v54 = vpop.f32.mrb[3].mxu0  ;;  %864 = vst.msk [vmem:[#allocation2 + $0x110] sm:$0xff] %vm22_vm1, %v800_v46  ;;  %v801_v55 = vadd.f32 %v1884_v53, %v122_v44  ;;  %v642_v57 = vpop.f32.mrb[3].mxu1 }
  0xdd   :  { %830 = vst.msk [vmem:[#allocation2] sm:$0xff] %vm22_vm1, %v766_v47  ;;  %v767_v56 = vadd.f32 %v514_v54, %v88_v45  ;;  %862 = vst.msk [vmem:[#allocation2 + $0x100] sm:$0xff] %vm22_vm1, %v798_v51  ;;  %v799_v58 = vadd.f32 %v642_v57, %v120_v50 }
  0xde   :  { %833 = vst.msk [vmem:[#allocation2 + $0x18] sm:$0xff] %vm22_vm1, %v769_v52  ;;  %865 = vst.msk [vmem:[#allocation2 + $0x118] sm:$0xff] %vm22_vm1, %v801_v55 }
  0xdf   :  { %831 = vst.msk [vmem:[#allocation2 + $0x8] sm:$0xff] %vm22_vm1, %v767_v56  ;;  %863 = vst.msk [vmem:[#allocation2 + $0x108] sm:$0xff] %vm22_vm1, %v799_v58 }
  0xe1   :  { %v1855_v63 = vpop.f32.mrb[4].mxu0  ;;  %v1887_v3 = vpop.f32.mrb[4].mxu1 }
  0xe2   :  { %v772_v2 = vadd.f32 %v1855_v63, %v93_v59  ;;  %v527_v4 = vpop.f32.mrb[5].mxu0  ;;  %v804_v9 = vadd.f32 %v1887_v3, %v125_v60  ;;  %v655_v11 = vpop.f32.mrb[5].mxu1 }
  0xe3   :  { %v899_v7 = vld [vmem:[#allocation2 + $0x10] sm:$0xff]  ;;  %v770_v10 = vadd.f32 %v527_v4, %v91_v61  ;;  %v1856_v12 = vpop.f32.mrb[6].mxu0  ;;  %v802_v17 = vadd.f32 %v655_v11, %v123_v0  ;;  %v1888_v19 = vpop.f32.mrb[6].mxu1 }
  0xe4   :  { %v970_v14 = vmul.f32 %v2256_v62, %v899_v7  ;;  %v931_v15 = vld [vmem:[#allocation2 + $0x110] sm:$0xff]  ;;  %v897_v16 = vld [vmem:[#allocation2] sm:$0xff]  ;;  %836 = vst.msk [vmem:[#allocation2 + $0x30] sm:$0xff] %vm22_vm1, %v772_v2  ;;  %v773_v18 = vadd.f32 %v1856_v12, %v94_v1  ;;  %v530_v20 = vpop.f32.mrb[7].mxu0  ;;  %868 = vst.msk [vmem:[#allocation2 + $0x130] sm:$0xff] %vm22_vm1, %v804_v9  ;;  %v805_v25 = vadd.f32 %v1888_v19, %v126_v5  ;;  %v658_v27 = vpop.f32.mrb[7].mxu1 }
  0xe5   :  { %v1002_v21 = vmul.f32 %v2256_v62, %v931_v15  ;;  %v968_v22 = vmul.f32 %v2256_v62, %v897_v16  ;;  %v929_v23 = vld [vmem:[#allocation2 + $0x100] sm:$0xff]  ;;  %v900_v24 = vld [vmem:[#allocation2 + $0x18] sm:$0xff]  ;;  %834 = vst.msk [vmem:[#allocation2 + $0x20] sm:$0xff] %vm22_vm1, %v770_v10  ;;  %v771_v26 = vadd.f32 %v530_v20, %v92_v6  ;;  %866 = vst.msk [vmem:[#allocation2 + $0x120] sm:$0xff] %vm22_vm1, %v802_v17 }
  0xe6   :  { %v1041_v28 = vadd.f32 %v2261_v8, %v970_v14  ;;  %v1000_v29 = vmul.f32 %v2256_v62, %v929_v23  ;;  %v971_v30 = vmul.f32 %v2256_v62, %v900_v24  ;;  %v932_v31 = vld [vmem:[#allocation2 + $0x118] sm:$0xff]  ;;  %v898_v32 = vld [vmem:[#allocation2 + $0x8] sm:$0xff]  ;;  %837 = vst.msk [vmem:[#allocation2 + $0x38] sm:$0xff] %vm22_vm1, %v773_v18  ;;  %v803_v33 = vadd.f32 %v658_v27, %v124_v13 }
  0xe7   :  { %v1073_v34 = vadd.f32 %v2261_v8, %v1002_v21  ;;  %v1039_v35 = vadd.f32 %v2261_v8, %v968_v22  ;;  %v1003_v36 = vmul.f32 %v2256_v62, %v932_v31  ;;  %v969_v37 = vmul.f32 %v2256_v62, %v898_v32  ;;  %869 = vst.msk [vmem:[#allocation2 + $0x138] sm:$0xff] %vm22_vm1, %v805_v25  ;;  %v930_v41 = vld [vmem:[#allocation2 + $0x108] sm:$0xff] }
  0xe8   :  { %835 = vst.msk [vmem:[#allocation2 + $0x28] sm:$0xff] %vm22_vm1, %v771_v26  ;;  %vm1105_vm3 = vcmp.ge.f32.partialorder %v1041_v28, 0.0  ;;  %v1169_v38 = vmul.f32 0.01, %v1041_v28  ;;  %v1071_v39 = vadd.f32 %v2261_v8, %v1000_v29  ;;  %v1042_v40 = vadd.f32 %v2261_v8, %v971_v30  ;;  %867 = vst.msk [vmem:[#allocation2 + $0x128] sm:$0xff] %vm22_vm1, %v803_v33 }
  0xe9   :  { %vm1137_vm4 = vcmp.ge.f32.partialorder %v1073_v34, 0.0  ;;  %v1201_v42 = vmul.f32 0.01, %v1073_v34  ;;  %vm1103_vm5 = vcmp.ge.f32.partialorder %v1039_v35, 0.0  ;;  %v1167_v43 = vmul.f32 0.01, %v1039_v35 }
  0xea   :  { %v1233_v44 = vsel %vm1105_vm3, %v1041_v28, %v1169_v38  ;;  %vm1135_vm6 = vcmp.ge.f32.partialorder %v1071_v39, 0.0  ;;  %v1199_v45 = vmul.f32 0.01, %v1071_v39  ;;  %vm1106_vm7 = vcmp.ge.f32.partialorder %v1042_v40, 0.0  ;;  %v2283_v46 = vpop.f32.mrb[8].mxu0  ;;  %v2285_v47 = vpop.f32.mrb[8].mxu1 }
  0xeb   :  { %v1752_v48 = vpack.c.bf16 %v1233_v44, %v1233_v44  ;;  %v1265_v49 = vsel %vm1137_vm4, %v1073_v34, %v1201_v42  ;;  %v1231_v50 = vsel %vm1103_vm5, %v1039_v35, %v1167_v43  ;;  %v1170_v51 = vmul.f32 0.01, %v1042_v40  ;;  %v903_v52 = vld [vmem:[#allocation2 + $0x30] sm:$0xff]  ;;  %v2287_v53 = vpop.f32.mrb[9].mxu0  ;;  %v2289_v54 = vpop.f32.mrb[9].mxu1 }
  0xec   :  { %v1784_v55 = vpack.c.bf16 %v1265_v49, %v1265_v49  ;;  %v1750_v56 = vpack.c.bf16 %v1231_v50, %v1231_v50  ;;  %v1263_v57 = vsel %vm1135_vm6, %v1071_v39, %v1199_v45  ;;  %v1074_v58 = vadd.f32 %v2261_v8, %v1003_v36  ;;  %v935_v59 = vld [vmem:[#allocation2 + $0x130] sm:$0xff]  ;;  %v2292_v60 = vpop.f32.mrb[10].mxu0  ;;  %v2294_v61 = vpop.f32.mrb[10].mxu1  ;;  %v901_v3 = vld [vmem:[#allocation2 + $0x20] sm:$0xff] }
  0xed   :  { %1554 = vst.msk [vmem:[%s2837_s4 + $0x8] sm:$0xf] %vm1551_vm2, %v1752_v48  ;;  %v1782_v63 = vpack.c.bf16 %v1263_v57, %v1263_v57  ;;  %v1234_v0 = vsel %vm1106_vm7, %v1042_v40, %v1170_v51  ;;  %v1040_v1 = vadd.f32 %v2261_v8, %v969_v37  ;;  %v1001_v2 = vmul.f32 %v2256_v62, %v930_v41  ;;  %v933_v4 = vld [vmem:[#allocation2 + $0x120] sm:$0xff]  ;;  %v2303_v5 = vpop.f32.mrb[11].mxu0  ;;  %v2305_v6 = vpop.f32.mrb[11].mxu1  ;;  %v904_v18 = vld [vmem:[#allocation2 + $0x38] sm:$0xff] }
  0xee   :  { %1586 = vst.msk [vmem:[%s2837_s4 + $0x88] sm:$0xf] %vm1551_vm2, %v1784_v55  ;;  %1552 = vst.msk [vmem:[%s2837_s4] sm:$0xf] %vm1551_vm2, %v1750_v56  ;;  %v1753_v7 = vpack.c.bf16 %v1234_v0, %v1234_v0  ;;  %vm1138_vm8 = vcmp.ge.f32.partialorder %v1074_v58, 0.0  ;;  %v974_v10 = vmul.f32 %v2256_v62, %v903_v52  ;;  %v1006_v13 = vmul.f32 %v2256_v62, %v935_v59  ;;  %v936_v32 = vld [vmem:[#allocation2 + $0x138] sm:$0xff] }
  0xef   :  { %v1202_v9 = vmul.f32 0.01, %v1074_v58  ;;  %1584 = vst.msk [vmem:[%s2837_s4 + $0x80] sm:$0xf] %vm1551_vm2, %v1782_v63  ;;  %vm1104_vm9 = vcmp.ge.f32.partialorder %v1040_v1, 0.0  ;;  %v1072_v12 = vadd.f32 %v2261_v8, %v1001_v2  ;;  %v972_v16 = vmul.f32 %v2256_v62, %v901_v3  ;;  %v902_v33 = vld [vmem:[#allocation2 + $0x28] sm:$0xff] }
  0xf0   :  { %v1168_v11 = vmul.f32 0.01, %v1040_v1  ;;  %1555 = vst.msk [vmem:[%s2837_s4 + $0xc] sm:$0xf] %vm1551_vm2, %v1753_v7  ;;  %v1045_v15 = vadd.f32 %v2261_v8, %v974_v10  ;;  %v1004_v17 = vmul.f32 %v2256_v62, %v933_v4  ;;  %v1077_v25 = vadd.f32 %v2261_v8, %v1006_v13  ;;  %v934_v39 = vld [vmem:[#allocation2 + $0x128] sm:$0xff]  ;;  %v97_v57 = vld [vmem:[#allocation2 + $0x50] sm:$0xff] }
  0xf1   :  { %v1266_v14 = vsel %vm1138_vm8, %v1074_v58, %v1202_v9  ;;  %vm1136_vm10 = vcmp.ge.f32.partialorder %v1072_v12, 0.0  ;;  %v1200_v21 = vmul.f32 0.01, %v1072_v12  ;;  %v2329_v22 = vpop.f32.mrb[12].mxu0  ;;  %v2332_v26 = vpop.f32.mrb[12].mxu1  ;;  %v1043_v29 = vadd.f32 %v2261_v8, %v972_v16  ;;  %v129_v58 = vld [vmem:[#allocation2 + $0x150] sm:$0xff] }
  0xf2   :  { %v1785_v19 = vpack.c.bf16 %v1266_v14, %v1266_v14  ;;  %v1232_v20 = vsel %vm1104_vm9, %v1040_v1, %v1168_v11  ;;  %vm1109_vm11 = vcmp.ge.f32.partialorder %v1045_v15, 0.0  ;;  %v1173_v24 = vmul.f32 0.01, %v1045_v15  ;;  %v2334_v27 = vpop.f32.mrb[13].mxu0  ;;  %v2343_v34 = vpop.f32.mrb[13].mxu1  ;;  %v95_v59 = vld [vmem:[#allocation2 + $0x40] sm:$0xff] }
  0xf3   :  { %v1751_v23 = vpack.c.bf16 %v1232_v20, %v1232_v20  ;;  %v1264_v28 = vsel %vm1136_vm10, %v1072_v12, %v1200_v21  ;;  %v1075_v30 = vadd.f32 %v2261_v8, %v1004_v17  ;;  %v975_v31 = vmul.f32 %v2256_v62, %v904_v18  ;;  %v2345_v35 = vpop.f32.mrb[14].mxu0  ;;  %v2352_v40 = vpop.f32.mrb[14].mxu1  ;;  %v127_v2 = vld [vmem:[#allocation2 + $0x140] sm:$0xff]  ;;  %v98_v10 = vld [vmem:[#allocation2 + $0x58] sm:$0xff]  ;;  %v96_v12 = vld [vmem:[#allocation2 + $0x48] sm:$0xff] }
  0xf4   :  { %1587 = vst.msk [vmem:[%s2837_s4 + $0x8c] sm:$0xf] %vm1551_vm2, %v1785_v19  ;;  %v1783_v36 = vpack.c.bf16 %v1264_v28, %v1264_v28  ;;  %v1237_v37 = vsel %vm1109_vm11, %v1045_v15, %v1173_v24  ;;  %vm1141_vm12 = vcmp.ge.f32.partialorder %v1077_v25, 0.0  ;;  %v1205_v38 = vmul.f32 0.01, %v1077_v25  ;;  %v2354_v41 = vpop.f32.mrb[15].mxu0 }
  0xf5   :  { %1553 = vst.msk [vmem:[%s2837_s4 + $0x4] sm:$0xf] %vm1551_vm2, %v1751_v23  ;;  %v1756_v42 = vpack.c.bf16 %v1237_v37, %v1237_v37  ;;  %vm1107_vm13 = vcmp.ge.f32.partialorder %v1043_v29, 0.0  ;;  %v1171_v43 = vmul.f32 0.01, %v1043_v29  ;;  %vm1139_vm14 = vcmp.ge.f32.partialorder %v1075_v30, 0.0 }
  0xf6   :  { %v2356_v44 = vpop.f32.mrb[15].mxu1  ;;  %1585 = vst.msk [vmem:[%s2837_s4 + $0x84] sm:$0xf] %vm1551_vm2, %v1783_v36  ;;  %v1269_v45 = vsel %vm1141_vm12, %v1077_v25, %v1205_v38  ;;  %v1203_v48 = vmul.f32 0.01, %v1075_v30  ;;  %v1046_v49 = vadd.f32 %v2261_v8, %v975_v31  ;;  %v1007_v50 = vmul.f32 %v2256_v62, %v936_v32  ;;  %v130_v11 = vld [vmem:[#allocation2 + $0x158] sm:$0xff] }
  0xf7   :  { %1558 = vst.msk [vmem:[%s2837_s4 + $0x18] sm:$0xf] %vm1551_vm2, %v1756_v42  ;;  %v1788_v51 = vpack.c.bf16 %v1269_v45, %v1269_v45  ;;  %v1235_v52 = vsel %vm1107_vm13, %v1043_v29, %v1171_v43  ;;  %v973_v55 = vmul.f32 %v2256_v62, %v902_v33  ;;  %v1005_v56 = vmul.f32 %v2256_v62, %v934_v39  ;;  %v128_v18 = vld [vmem:[#allocation2 + $0x148] sm:$0xff]  ;;  %v101_v19 = vld [vmem:[#allocation2 + $0x70] sm:$0xff]  ;;  %v102_v28 = vld [vmem:[#allocation2 + $0x78] sm:$0xff] }
  0xf8   :  { %v1754_v63 = vpack.c.bf16 %v1235_v52, %v1235_v52  ;;  %v1267_v0 = vsel %vm1139_vm14, %v1075_v30, %v1203_v48  ;;  %vm1110_vm15 = vcmp.ge.f32.partialorder %v1046_v49, 0.0  ;;  %v1174_v1 = vmul.f32 0.01, %v1046_v49  ;;  %v133_v20 = vld [vmem:[#allocation2 + $0x170] sm:$0xff]  ;;  %v100_v43 = vld [vmem:[#allocation2 + $0x68] sm:$0xff] }
  0xf9   :  { %1590 = vst.msk [vmem:[%s2837_s4 + $0x98] sm:$0xf] %vm1551_vm2, %v1788_v51  ;;  %v1786_v3 = vpack.c.bf16 %v1267_v0, %v1267_v0  ;;  %v1078_v4 = vadd.f32 %v2261_v8, %v1007_v50  ;;  %v1044_v7 = vadd.f32 %v2261_v8, %v973_v55  ;;  %v1076_v9 = vadd.f32 %v2261_v8, %v1005_v56  ;;  %v2378_v13 = vpop.f32.mrb[16].mxu0  ;;  %v2387_v21 = vpop.f32.mrb[16].mxu1  ;;  %v132_v45 = vld [vmem:[#allocation2 + $0x168] sm:$0xff]  ;;  %v105_v48 = vld [vmem:[#allocation2 + $0x90] sm:$0xff] }
  0xfa   :  { %1556 = vst.msk [vmem:[%s2837_s4 + $0x10] sm:$0xf] %vm1551_vm2, %v1754_v63  ;;  %v1238_v14 = vsel %vm1110_vm15, %v1046_v49, %v1174_v1  ;;  %v776_v15 = vadd.f32 %v2283_v46, %v97_v57  ;;  %v808_v16 = vadd.f32 %v2285_v47, %v129_v58  ;;  %v774_v17 = vadd.f32 %v2287_v53, %v95_v59  ;;  %v2389_v23 = vpop.f32.mrb[17].mxu0  ;;  %v99_v46 = vld [vmem:[#allocation2 + $0x60] sm:$0xff]  ;;  %v134_v53 = vld [vmem:[#allocation2 + $0x178] sm:$0xff]  ;;  %v2395_v29 = vpop.f32.mrb[17].mxu1 }
  0xfb   :  { %1588 = vst.msk [vmem:[%s2837_s4 + $0x90] sm:$0xf] %vm1551_vm2, %v1786_v3  ;;  %v1757_v24 = vpack.c.bf16 %v1238_v14, %v1238_v14  ;;  %vm1142_vm0 = vcmp.ge.f32.partialorder %v1078_v4, 0.0  ;;  %v1206_v25 = vmul.f32 0.01, %v1078_v4  ;;  %vm1108_vm3 = vcmp.ge.f32.partialorder %v1044_v7, 0.0 }
  0xfc   :  { %v131_v47 = vld [vmem:[#allocation2 + $0x160] sm:$0xff]  ;;  %v2397_v30 = vpop.f32.mrb[18].mxu0  ;;  %v1172_v31 = vmul.f32 0.01, %v1044_v7  ;;  %vm1140_vm4 = vcmp.ge.f32.partialorder %v1076_v9, 0.0  ;;  %840 = vst.msk [vmem:[#allocation2 + $0x50] sm:$0xff] %vm22_vm1, %v776_v15  ;;  %v806_v33 = vadd.f32 %v2289_v54, %v127_v2  ;;  %v777_v38 = vadd.f32 %v2292_v60, %v98_v10 }
  0xfd   :  { %v1204_v32 = vmul.f32 0.01, %v1076_v9  ;;  %872 = vst.msk [vmem:[#allocation2 + $0x150] sm:$0xff] %vm22_vm1, %v808_v16  ;;  %838 = vst.msk [vmem:[#allocation2 + $0x40] sm:$0xff] %vm22_vm1, %v774_v17  ;;  %v1900_v36 = vpop.f32.mrb[18].mxu1  ;;  %v1270_v37 = vsel %vm1142_vm0, %v1078_v4, %v1206_v25  ;;  %v809_v39 = vadd.f32 %v2294_v61, %v130_v11  ;;  %v775_v42 = vadd.f32 %v2303_v5, %v96_v12  ;;  %v578_v49 = vpop.f32.mrb[19].mxu0 }
  0xfe   :  { %1559 = vst.msk [vmem:[%s2837_s4 + $0x1c] sm:$0xf] %vm1551_vm2, %v1757_v24  ;;  %v706_v50 = vpop.f32.mrb[19].mxu1  ;;  %v1789_v54 = vpack.c.bf16 %v1270_v37, %v1270_v37  ;;  %v1236_v51 = vsel %vm1108_vm3, %v1044_v7, %v1172_v31  ;;  %v807_v55 = vadd.f32 %v2305_v6, %v128_v18  ;;  %v137_v56 = vld [vmem:[#allocation2 + $0x190] sm:$0xff]  ;;  %v103_v60 = vld [vmem:[#allocation2 + $0x80] sm:$0xff]  ;;  %v780_v5 = vadd.f32 %v2329_v22, %v101_v19  ;;  %v106_v63 = vld [vmem:[#allocation2 + $0x98] sm:$0xff] }
  0xff   :  { %v1268_v52 = vsel %vm1140_vm4, %v1076_v9, %v1204_v32  ;;  %870 = vst.msk [vmem:[#allocation2 + $0x140] sm:$0xff] %vm22_vm1, %v806_v33  ;;  %v135_v57 = vld [vmem:[#allocation2 + $0x180] sm:$0xff]  ;;  %v1755_v61 = vpack.c.bf16 %v1236_v51, %v1236_v51  ;;  %841 = vst.msk [vmem:[#allocation2 + $0x58] sm:$0xff] %vm22_vm1, %v777_v38  ;;  %v812_v59 = vadd.f32 %v2332_v26, %v133_v20  ;;  %v138_v0 = vld [vmem:[#allocation2 + $0x198] sm:$0xff] }
 0x100   :  { %v1787_v58 = vpack.c.bf16 %v1268_v52, %v1268_v52  ;;  %873 = vst.msk [vmem:[#allocation2 + $0x158] sm:$0xff] %vm22_vm1, %v809_v39  ;;  %839 = vst.msk [vmem:[#allocation2 + $0x48] sm:$0xff] %vm22_vm1, %v775_v42  ;;  %v104_v1 = vld [vmem:[#allocation2 + $0x88] sm:$0xff]  ;;  %v778_v6 = vadd.f32 %v2334_v27, %v99_v46  ;;  %v810_v2 = vadd.f32 %v2343_v34, %v131_v47  ;;  %v109_v26 = vld [vmem:[#allocation2 + $0xb0] sm:$0xff] }
 0x101   :  { %1591 = vst.msk [vmem:[%s2837_s4 + $0x9c] sm:$0xf] %vm1551_vm2, %v1789_v54  ;;  %v781_v3 = vadd.f32 %v2345_v35, %v102_v28  ;;  %v813_v22 = vadd.f32 %v2352_v40, %v134_v53  ;;  %v136_v4 = vld [vmem:[#allocation2 + $0x188] sm:$0xff]  ;;  %v141_v7 = vld [vmem:[#allocation2 + $0x1b0] sm:$0xff]  ;;  %1557 = vst.msk [vmem:[%s2837_s4 + $0x14] sm:$0xf] %vm1551_vm2, %v1755_v61  ;;  %v779_v27 = vadd.f32 %v2354_v41, %v100_v43 }
 0x102   :  { %871 = vst.msk [vmem:[#allocation2 + $0x148] sm:$0xff] %vm22_vm1, %v807_v55  ;;  %844 = vst.msk [vmem:[#allocation2 + $0x70] sm:$0xff] %vm22_vm1, %v780_v5  ;;  %v811_v34 = vadd.f32 %v2356_v44, %v132_v45  ;;  %v784_v35 = vadd.f32 %v2378_v13, %v105_v48  ;;  %v816_v40 = vadd.f32 %v2387_v21, %v137_v56  ;;  %v1871_v9 = vpop.f32.mrb[20].mxu0  ;;  %v107_v10 = vld [vmem:[#allocation2 + $0xa0] sm:$0xff]  ;;  %v1903_v14 = vpop.f32.mrb[20].mxu1  ;;  %v110_v16 = vld [vmem:[#allocation2 + $0xb8] sm:$0xff] }
 0x103   :  { %1589 = vst.msk [vmem:[%s2837_s4 + $0x94] sm:$0xf] %vm1551_vm2, %v1787_v58  ;;  %v139_v11 = vld [vmem:[#allocation2 + $0x1a0] sm:$0xff]  ;;  %v782_v12 = vadd.f32 %v2389_v23, %v103_v60  ;;  %v814_v41 = vadd.f32 %v2395_v29, %v135_v57  ;;  %v785_v44 = vadd.f32 %v2397_v30, %v106_v63  ;;  %v817_v13 = vadd.f32 %v1900_v36, %v138_v0  ;;  %v591_v15 = vpop.f32.mrb[21].mxu0  ;;  %v142_v17 = vld [vmem:[#allocation2 + $0x1b8] sm:$0xff]  ;;  %v108_v18 = vld [vmem:[#allocation2 + $0xa8] sm:$0xff] }
 0x104   :  { %876 = vst.msk [vmem:[#allocation2 + $0x170] sm:$0xff] %vm22_vm1, %v812_v59  ;;  %842 = vst.msk [vmem:[#allocation2 + $0x60] sm:$0xff] %vm22_vm1, %v778_v6  ;;  %v907_v19 = vld [vmem:[#allocation2 + $0x50] sm:$0xff]  ;;  %v905_v21 = vld [vmem:[#allocation2 + $0x40] sm:$0xff]  ;;  %v783_v23 = vadd.f32 %v578_v49, %v104_v1  ;;  %v815_v24 = vadd.f32 %v706_v50, %v136_v4  ;;  %v788_v25 = vadd.f32 %v1871_v9, %v109_v26  ;;  %v719_v47 = vpop.f32.mrb[21].mxu1  ;;  %v1872_v28 = vpop.f32.mrb[22].mxu0 }
 0x105   :  { %874 = vst.msk [vmem:[#allocation2 + $0x160] sm:$0xff] %vm22_vm1, %v810_v2  ;;  %845 = vst.msk [vmem:[#allocation2 + $0x78] sm:$0xff] %vm22_vm1, %v781_v3  ;;  %v939_v20 = vld [vmem:[#allocation2 + $0x150] sm:$0xff]  ;;  %v820_v46 = vadd.f32 %v1903_v14, %v141_v7  ;;  %v978_v53 = vmul.f32 %v2256_v62, %v907_v19  ;;  %v976_v30 = vmul.f32 %v2256_v62, %v905_v21  ;;  %v1904_v32 = vpop.f32.mrb[22].mxu1  ;;  %v594_v33 = vpop.f32.mrb[23].mxu0  ;;  %v140_v36 = vld [vmem:[#allocation2 + $0x1a8] sm:$0xff] }
 0x106   :  { %877 = vst.msk [vmem:[#allocation2 + $0x178] sm:$0xff] %vm22_vm1, %v813_v22  ;;  %843 = vst.msk [vmem:[#allocation2 + $0x68] sm:$0xff] %vm22_vm1, %v779_v27  ;;  %v1010_v29 = vmul.f32 %v2256_v62, %v939_v20  ;;  %v786_v31 = vadd.f32 %v591_v15, %v107_v10  ;;  %v937_v37 = vld [vmem:[#allocation2 + $0x140] sm:$0xff]  ;;  %v818_v38 = vadd.f32 %v719_v47, %v139_v11  ;;  %v722_v45 = vpop.f32.mrb[23].mxu1  ;;  %v908_v51 = vld [vmem:[#allocation2 + $0x58] sm:$0xff] }
 0x107   :  { %875 = vst.msk [vmem:[#allocation2 + $0x168] sm:$0xff] %vm22_vm1, %v811_v34  ;;  %848 = vst.msk [vmem:[#allocation2 + $0x90] sm:$0xff] %vm22_vm1, %v784_v35  ;;  %v789_v39 = vadd.f32 %v1872_v28, %v110_v16  ;;  %v821_v42 = vadd.f32 %v1904_v32, %v142_v17  ;;  %v787_v43 = vadd.f32 %v594_v33, %v108_v18  ;;  %v940_v52 = vld [vmem:[#allocation2 + $0x158] sm:$0xff]  ;;  %v906_v55 = vld [vmem:[#allocation2 + $0x48] sm:$0xff] }
 0x108   :  { %880 = vst.msk [vmem:[#allocation2 + $0x190] sm:$0xff] %vm22_vm1, %v816_v40  ;;  %846 = vst.msk [vmem:[#allocation2 + $0x80] sm:$0xff] %vm22_vm1, %v782_v12  ;;  %v1049_v48 = vadd.f32 %v2261_v8, %v978_v53  ;;  %v1081_v49 = vadd.f32 %v2261_v8, %v1010_v29  ;;  %v1047_v50 = vadd.f32 %v2261_v8, %v976_v30 }
 0x109   :  { %878 = vst.msk [vmem:[#allocation2 + $0x180] sm:$0xff] %vm22_vm1, %v814_v41  ;;  %849 = vst.msk [vmem:[#allocation2 + $0x98] sm:$0xff] %vm22_vm1, %v785_v44  ;;  %v1008_v54 = vmul.f32 %v2256_v62, %v937_v37  ;;  %v979_v56 = vmul.f32 %v2256_v62, %v908_v51  ;;  %v1011_v60 = vmul.f32 %v2256_v62, %v940_v52  ;;  %v2482_v22 = vpop.f32.mrb[24].mxu0  ;;  %v2484_v4 = vpop.f32.mrb[24].mxu1  ;;  %v938_v34 = vld [vmem:[#allocation2 + $0x148] sm:$0xff]  ;;  %v911_v35 = vld [vmem:[#allocation2 + $0x70] sm:$0xff] }
 0x10a   :  { %881 = vst.msk [vmem:[#allocation2 + $0x198] sm:$0xff] %vm22_vm1, %v817_v13  ;;  %847 = vst.msk [vmem:[#allocation2 + $0x88] sm:$0xff] %vm22_vm1, %v783_v23  ;;  %v977_v57 = vmul.f32 %v2256_v62, %v906_v55  ;;  %v819_v61 = vadd.f32 %v722_v45, %v140_v36  ;;  %vm1113_vm5 = vcmp.ge.f32.partialorder %v1049_v48, 0.0  ;;  %v1177_v58 = vmul.f32 0.01, %v1049_v48  ;;  %v2486_v40 = vpop.f32.mrb[25].mxu0 }
 0x10b   :  { %879 = vst.msk [vmem:[#allocation2 + $0x188] sm:$0xff] %vm22_vm1, %v815_v24  ;;  %852 = vst.msk [vmem:[#allocation2 + $0xb0] sm:$0xff] %vm22_vm1, %v788_v25  ;;  %vm1145_vm6 = vcmp.ge.f32.partialorder %v1081_v49, 0.0  ;;  %v1209_v5 = vmul.f32 0.01, %v1081_v49  ;;  %vm1111_vm7 = vcmp.ge.f32.partialorder %v1047_v50, 0.0  ;;  %v1079_v63 = vadd.f32 %v2261_v8, %v1008_v54 }
 0x10c   :  { %884 = vst.msk [vmem:[#allocation2 + $0x1b0] sm:$0xff] %vm22_vm1, %v820_v46  ;;  %850 = vst.msk [vmem:[#allocation2 + $0xa0] sm:$0xff] %vm22_vm1, %v786_v31  ;;  %v1175_v59 = vmul.f32 0.01, %v1047_v50  ;;  %v1050_v0 = vadd.f32 %v2261_v8, %v979_v56  ;;  %v1241_v1 = vsel %vm1113_vm5, %v1049_v48, %v1177_v58  ;;  %v1082_v2 = vadd.f32 %v2261_v8, %v1011_v60  ;;  %v2488_v9 = vpop.f32.mrb[25].mxu1  ;;  %v943_v41 = vld [vmem:[#allocation2 + $0x170] sm:$0xff] }
 0x10d   :  { %882 = vst.msk [vmem:[#allocation2 + $0x1a0] sm:$0xff] %vm22_vm1, %v818_v38  ;;  %853 = vst.msk [vmem:[#allocation2 + $0xb8] sm:$0xff] %vm22_vm1, %v789_v39  ;;  %v1273_v6 = vsel %vm1145_vm6, %v1081_v49, %v1209_v5  ;;  %v1048_v3 = vadd.f32 %v2261_v8, %v977_v57  ;;  %v1760_v26 = vpack.c.bf16 %v1241_v1, %v1241_v1  ;;  %vm1143_vm8 = vcmp.ge.f32.partialorder %v1079_v63, 0.0  ;;  %v909_v18 = vld [vmem:[#allocation2 + $0x60] sm:$0xff]  ;;  %v912_v20 = vld [vmem:[#allocation2 + $0x78] sm:$0xff]  ;;  %v2505_v21 = vpop.f32.mrb[26].mxu0 }
 0x10e   :  { %885 = vst.msk [vmem:[#allocation2 + $0x1b8] sm:$0xff] %vm22_vm1, %v821_v42  ;;  %851 = vst.msk [vmem:[#allocation2 + $0xa8] sm:$0xff] %vm22_vm1, %v787_v43  ;;  %v1792_v7 = vpack.c.bf16 %v1273_v6, %v1273_v6  ;;  %v1239_v27 = vsel %vm1111_vm7, %v1047_v50, %v1175_v59  ;;  %v1207_v11 = vmul.f32 0.01, %v1079_v63  ;;  %vm1114_vm9 = vcmp.ge.f32.partialorder %v1050_v0, 0.0  ;;  %v941_v19 = vld [vmem:[#allocation2 + $0x160] sm:$0xff] }
 0x10f   :  { %883 = vst.msk [vmem:[#allocation2 + $0x1a8] sm:$0xff] %vm22_vm1, %v819_v61  ;;  %v1758_v10 = vpack.c.bf16 %v1239_v27, %v1239_v27  ;;  %v1178_v12 = vmul.f32 0.01, %v1050_v0  ;;  %vm1146_vm10 = vcmp.ge.f32.partialorder %v1082_v2, 0.0  ;;  %v1210_v44 = vmul.f32 0.01, %v1082_v2 }
 0x110   :  { %1562 = vst.msk [vmem:[%s2837_s4 + $0x28] sm:$0xf] %vm1551_vm2, %v1760_v26  ;;  %1594 = vst.msk [vmem:[%s2837_s4 + $0xa8] sm:$0xf] %vm1551_vm2, %v1792_v7  ;;  %vm1112_vm11 = vcmp.ge.f32.partialorder %v1048_v3, 0.0  ;;  %v1271_v14 = vsel %vm1143_vm8, %v1079_v63, %v1207_v11  ;;  %v1009_v16 = vmul.f32 %v2256_v62, %v938_v34  ;;  %v982_v17 = vmul.f32 %v2256_v62, %v911_v35  ;;  %v2507_v23 = vpop.f32.mrb[26].mxu1 }
 0x111   :  { %v1176_v13 = vmul.f32 0.01, %v1048_v3  ;;  %1560 = vst.msk [vmem:[%s2837_s4 + $0x20] sm:$0xf] %vm1551_vm2, %v1758_v10  ;;  %v1242_v15 = vsel %vm1114_vm9, %v1050_v0, %v1178_v12  ;;  %v1790_v24 = vpack.c.bf16 %v1271_v14, %v1271_v14  ;;  %v1274_v46 = vsel %vm1146_vm10, %v1082_v2, %v1210_v44  ;;  %v2510_v28 = vpop.f32.mrb[27].mxu0  ;;  %v2512_v53 = vpop.f32.mrb[27].mxu1 }
 0x112   :  { %v1761_v25 = vpack.c.bf16 %v1242_v15, %v1242_v15  ;;  %v1793_v29 = vpack.c.bf16 %v1274_v46, %v1274_v46  ;;  %v1080_v31 = vadd.f32 %v2261_v8, %v1009_v16  ;;  %v1053_v32 = vadd.f32 %v2261_v8, %v982_v17  ;;  %v944_v39 = vld [vmem:[#allocation2 + $0x178] sm:$0xff]  ;;  %v910_v42 = vld [vmem:[#allocation2 + $0x68] sm:$0xff]  ;;  %v2528_v43 = vpop.f32.mrb[28].mxu0  ;;  %v2542_v52 = vpop.f32.mrb[28].mxu1  ;;  %v915_v44 = vld [vmem:[#allocation2 + $0x90] sm:$0xff] }
 0x113   :  { %v1240_v47 = vsel %vm1112_vm11, %v1048_v3, %v1176_v13  ;;  %1592 = vst.msk [vmem:[%s2837_s4 + $0xa0] sm:$0xf] %vm1551_vm2, %v1790_v24  ;;  %v1014_v33 = vmul.f32 %v2256_v62, %v943_v41  ;;  %v980_v36 = vmul.f32 %v2256_v62, %v909_v18  ;;  %v1012_v37 = vmul.f32 %v2256_v62, %v941_v19  ;;  %v2544_v55 = vpop.f32.mrb[29].mxu0  ;;  %v2548_v58 = vpop.f32.mrb[29].mxu1  ;;  %v942_v34 = vld [vmem:[#allocation2 + $0x168] sm:$0xff]  ;;  %v947_v13 = vld [vmem:[#allocation2 + $0x190] sm:$0xff] }
 0x114   :  { %v1759_v30 = vpack.c.bf16 %v1240_v47, %v1240_v47  ;;  %1563 = vst.msk [vmem:[%s2837_s4 + $0x2c] sm:$0xf] %vm1551_vm2, %v1761_v25  ;;  %v983_v38 = vmul.f32 %v2256_v62, %v912_v20  ;;  %1595 = vst.msk [vmem:[%s2837_s4 + $0xac] sm:$0xf] %vm1551_vm2, %v1793_v29  ;;  %vm1144_vm12 = vcmp.ge.f32.partialorder %v1080_v31, 0.0  ;;  %vm1117_vm13 = vcmp.ge.f32.partialorder %v1053_v32, 0.0 }
 0x115   :  { %v1208_v45 = vmul.f32 0.01, %v1080_v31  ;;  %v1181_v48 = vmul.f32 0.01, %v1053_v32  ;;  %v1085_v49 = vadd.f32 %v2261_v8, %v1014_v33  ;;  %v1051_v50 = vadd.f32 %v2261_v8, %v980_v36  ;;  %v2550_v5 = vpop.f32.mrb[30].mxu0  ;;  %v2552_v1 = vpop.f32.mrb[30].mxu1 }
 0x116   :  { %1561 = vst.msk [vmem:[%s2837_s4 + $0x24] sm:$0xf] %vm1551_vm2, %v1759_v30  ;;  %v1083_v54 = vadd.f32 %v2261_v8, %v1012_v37  ;;  %v1054_v51 = vadd.f32 %v2261_v8, %v983_v38  ;;  %v1015_v57 = vmul.f32 %v2256_v62, %v944_v39  ;;  %v981_v61 = vmul.f32 %v2256_v62, %v910_v42  ;;  %v2554_v6 = vpop.f32.mrb[31].mxu0  ;;  %v2565_v35 = vpop.f32.mrb[31].mxu1  ;;  %v913_v14 = vld [vmem:[#allocation2 + $0x80] sm:$0xff]  ;;  %v916_v19 = vld [vmem:[#allocation2 + $0x98] sm:$0xff] }
 0x117   :  { %v1272_v56 = vsel %vm1144_vm12, %v1080_v31, %v1208_v45  ;;  %v1245_v60 = vsel %vm1117_vm13, %v1053_v32, %v1181_v48  ;;  %vm1149_vm14 = vcmp.ge.f32.partialorder %v1085_v49, 0.0  ;;  %v1213_v0 = vmul.f32 0.01, %v1085_v49  ;;  %v945_v18 = vld [vmem:[#allocation2 + $0x180] sm:$0xff] }
 0x118   :  { %v1791_v59 = vpack.c.bf16 %v1272_v56, %v1272_v56  ;;  %v1764_v63 = vpack.c.bf16 %v1245_v60, %v1245_v60  ;;  %vm1115_vm15 = vcmp.ge.f32.partialorder %v1051_v50, 0.0  ;;  %v1179_v2 = vmul.f32 0.01, %v1051_v50 }
 0x119   :  { %vm1147_vm0 = vcmp.ge.f32.partialorder %v1083_v54, 0.0  ;;  %v1211_v3 = vmul.f32 0.01, %v1083_v54  ;;  %v1277_v26 = vsel %vm1149_vm14, %v1085_v49, %v1213_v0  ;;  %vm1118_vm3 = vcmp.ge.f32.partialorder %v1054_v51, 0.0  ;;  %v914_v0 = vld [vmem:[#allocation2 + $0x88] sm:$0xff] }
 0x11a   :  { %1593 = vst.msk [vmem:[%s2837_s4 + $0xa4] sm:$0xf] %vm1551_vm2, %v1791_v59  ;;  %1566 = vst.msk [vmem:[%s2837_s4 + $0x38] sm:$0xf] %vm1551_vm2, %v1764_v63  ;;  %v1182_v7 = vmul.f32 0.01, %v1054_v51  ;;  %v1086_v27 = vadd.f32 %v2261_v8, %v1015_v57  ;;  %v1796_v10 = vpack.c.bf16 %v1277_v26, %v1277_v26  ;;  %v1243_v11 = vsel %vm1115_vm15, %v1051_v50, %v1179_v2 }
 0x11b   :  { %v1275_v12 = vsel %vm1147_vm0, %v1083_v54, %v1211_v3  ;;  %v1052_v41 = vadd.f32 %v2261_v8, %v981_v61  ;;  %v1762_v15 = vpack.c.bf16 %v1243_v11, %v1243_v11  ;;  %v1013_v46 = vmul.f32 %v2256_v62, %v942_v34  ;;  %v948_v63 = vld [vmem:[#allocation2 + $0x198] sm:$0xff]  ;;  %v946_v2 = vld [vmem:[#allocation2 + $0x188] sm:$0xff]  ;;  %v919_v34 = vld [vmem:[#allocation2 + $0xb0] sm:$0xff] }
 0x11c   :  { %v1794_v16 = vpack.c.bf16 %v1275_v12, %v1275_v12  ;;  %v1246_v17 = vsel %vm1118_vm3, %v1054_v51, %v1182_v7  ;;  %vm1150_vm4 = vcmp.ge.f32.partialorder %v1086_v27, 0.0  ;;  %1598 = vst.msk [vmem:[%s2837_s4 + $0xb8] sm:$0xf] %vm1551_vm2, %v1796_v10  ;;  %v1214_v24 = vmul.f32 0.01, %v1086_v27  ;;  %v951_v10 = vld [vmem:[#allocation2 + $0x1b0] sm:$0xff] }
 0x11d   :  { %v1765_v20 = vpack.c.bf16 %v1246_v17, %v1246_v17  ;;  %vm1116_vm5 = vcmp.ge.f32.partialorder %v1052_v41, 0.0  ;;  %v1180_v25 = vmul.f32 0.01, %v1052_v41  ;;  %1564 = vst.msk [vmem:[%s2837_s4 + $0x30] sm:$0xf] %vm1551_vm2, %v1762_v15  ;;  %v986_v47 = vmul.f32 %v2256_v62, %v915_v44  ;;  %v917_v11 = vld [vmem:[#allocation2 + $0xa0] sm:$0xff] }
 0x11e   :  { %1596 = vst.msk [vmem:[%s2837_s4 + $0xb0] sm:$0xf] %vm1551_vm2, %v1794_v16  ;;  %v1018_v29 = vmul.f32 %v2256_v62, %v947_v13  ;;  %v984_v30 = vmul.f32 %v2256_v62, %v913_v14  ;;  %v1278_v31 = vsel %vm1150_vm4, %v1086_v27, %v1214_v24  ;;  %v1016_v33 = vmul.f32 %v2256_v62, %v945_v18  ;;  %v949_v13 = vld [vmem:[#allocation2 + $0x1a0] sm:$0xff] }
 0x11f   :  { %1567 = vst.msk [vmem:[%s2837_s4 + $0x3c] sm:$0xf] %vm1551_vm2, %v1765_v20  ;;  %v1244_v32 = vsel %vm1116_vm5, %v1052_v41, %v1180_v25  ;;  %v987_v36 = vmul.f32 %v2256_v62, %v916_v19  ;;  %v1797_v37 = vpack.c.bf16 %v1278_v31, %v1278_v31  ;;  %v1084_v39 = vadd.f32 %v2261_v8, %v1013_v46 }
 0x120   :  { %v1763_v38 = vpack.c.bf16 %v1244_v32, %v1244_v32  ;;  %v1057_v42 = vadd.f32 %v2261_v8, %v986_v47  ;;  %v1089_v45 = vadd.f32 %v2261_v8, %v1018_v29  ;;  %v1055_v48 = vadd.f32 %v2261_v8, %v984_v30 }
 0x121   :  { %v1087_v49 = vadd.f32 %v2261_v8, %v1016_v33  ;;  %v1058_v50 = vadd.f32 %v2261_v8, %v987_v36  ;;  %1599 = vst.msk [vmem:[%s2837_s4 + $0xbc] sm:$0xf] %vm1551_vm2, %v1797_v37  ;;  %vm1148_vm6 = vcmp.ge.f32.partialorder %v1084_v39, 0.0  ;;  %v1212_v54 = vmul.f32 0.01, %v1084_v39 }
 0x122   :  { %1565 = vst.msk [vmem:[%s2837_s4 + $0x34] sm:$0xf] %vm1551_vm2, %v1763_v38  ;;  %vm1121_vm7 = vcmp.ge.f32.partialorder %v1057_v42, 0.0  ;;  %v1185_v51 = vmul.f32 0.01, %v1057_v42  ;;  %vm1153_vm8 = vcmp.ge.f32.partialorder %v1089_v45, 0.0  ;;  %v1019_v16 = vmul.f32 %v2256_v62, %v948_v63 }
 0x123   :  { %v1217_v56 = vmul.f32 0.01, %v1089_v45  ;;  %vm1119_vm9 = vcmp.ge.f32.partialorder %v1055_v48, 0.0  ;;  %v1183_v60 = vmul.f32 0.01, %v1055_v48  ;;  %v1276_v57 = vsel %vm1148_vm6, %v1084_v39, %v1212_v54 }
 0x124   :  { %v1249_v61 = vsel %vm1121_vm7, %v1057_v42, %v1185_v51  ;;  %vm1151_vm10 = vcmp.ge.f32.partialorder %v1087_v49, 0.0  ;;  %v1215_v59 = vmul.f32 0.01, %v1087_v49  ;;  %v1795_v3 = vpack.c.bf16 %v1276_v57, %v1276_v57  ;;  %v950_v57 = vld [vmem:[#allocation2 + $0x1a8] sm:$0xff] }
 0x125   :  { %v1768_v26 = vpack.c.bf16 %v1249_v61, %v1249_v61  ;;  %v1281_v7 = vsel %vm1153_vm8, %v1089_v45, %v1217_v56  ;;  %v1247_v27 = vsel %vm1119_vm9, %v1055_v48, %v1183_v60  ;;  %vm1122_vm11 = vcmp.ge.f32.partialorder %v1058_v50, 0.0  ;;  %v920_v48 = vld [vmem:[#allocation2 + $0xb8] sm:$0xff]  ;;  %v918_v60 = vld [vmem:[#allocation2 + $0xa8] sm:$0xff] }
 0x126   :  { %v1800_v12 = vpack.c.bf16 %v1281_v7, %v1281_v7  ;;  %v1766_v41 = vpack.c.bf16 %v1247_v27, %v1247_v27  ;;  %v1279_v44 = vsel %vm1151_vm10, %v1087_v49, %v1215_v59  ;;  %1597 = vst.msk [vmem:[%s2837_s4 + $0xb4] sm:$0xf] %vm1551_vm2, %v1795_v3  ;;  %v1186_v15 = vmul.f32 0.01, %v1058_v50  ;;  %v952_v49 = vld [vmem:[#allocation2 + $0x1b8] sm:$0xff] }
 0x127   :  { %1570 = vst.msk [vmem:[%s2837_s4 + $0x48] sm:$0xf] %vm1551_vm2, %v1768_v26  ;;  %v1798_v14 = vpack.c.bf16 %v1279_v44, %v1279_v44  ;;  %v985_v17 = vmul.f32 %v2256_v62, %v914_v0  ;;  %v1017_v18 = vmul.f32 %v2256_v62, %v946_v2  ;;  %v990_v19 = vmul.f32 %v2256_v62, %v919_v34  ;;  %v2653_v26 = vld [vmem:[%s2835_s2] ss:$0 sm:$0xff]  ;;  %v113_v34 = vld [vmem:[#allocation2 + $0xd0] sm:$0xff] }
 0x128   :  { %1602 = vst.msk [vmem:[%s2837_s4 + $0xc8] sm:$0xf] %vm1551_vm2, %v1800_v12  ;;  %1568 = vst.msk [vmem:[%s2837_s4 + $0x40] sm:$0xf] %vm1551_vm2, %v1766_v41  ;;  %v1022_v20 = vmul.f32 %v2256_v62, %v951_v10  ;;  %v988_v24 = vmul.f32 %v2256_v62, %v917_v11  ;;  %v1250_v25 = vsel %vm1122_vm11, %v1058_v50, %v1186_v15  ;;  %v2674_v41 = vld [vmem:[%s2836_s3] ss:$0 sm:$0xff] }
 0x129   :  { %1600 = vst.msk [vmem:[%s2837_s4 + $0xc0] sm:$0xf] %vm1551_vm2, %v1798_v14  ;;  %v1090_v46 = vadd.f32 %v2261_v8, %v1019_v16  ;;  %v1056_v47 = vadd.f32 %v2261_v8, %v985_v17  ;;  %v1020_v29 = vmul.f32 %v2256_v62, %v949_v13  ;;  %v1769_v30 = vpack.c.bf16 %v1250_v25, %v1250_v25  ;;  %v111_v25 = vld [vmem:[#allocation2 + $0xc0] sm:$0xff] }
 0x12a   :  { %v1088_v31 = vadd.f32 %v2261_v8, %v1017_v18  ;;  %v1061_v32 = vadd.f32 %v2261_v8, %v990_v19  ;;  %v1093_v33 = vadd.f32 %v2261_v8, %v1022_v20  ;;  %v1059_v0 = vadd.f32 %v2261_v8, %v988_v24  ;;  %v145_v18 = vld [vmem:[#allocation2 + $0x1d0] sm:$0xff] }
 0x12b   :  { %vm1154_vm12 = vcmp.ge.f32.partialorder %v1090_v46, 0.0  ;;  %v1218_v36 = vmul.f32 0.01, %v1090_v46  ;;  %vm1120_vm13 = vcmp.ge.f32.partialorder %v1056_v47, 0.0  ;;  %v1184_v37 = vmul.f32 0.01, %v1056_v47 }
 0x12c   :  { %1571 = vst.msk [vmem:[%s2837_s4 + $0x4c] sm:$0xf] %vm1551_vm2, %v1769_v30  ;;  %vm1152_vm14 = vcmp.ge.f32.partialorder %v1088_v31, 0.0  ;;  %v1216_v38 = vmul.f32 0.01, %v1088_v31  ;;  %vm1125_vm15 = vcmp.ge.f32.partialorder %v1061_v32, 0.0  ;;  %v1091_v3 = vadd.f32 %v2261_v8, %v1020_v29 }
 0x12d   :  { %v1189_v62 = vmul.f32 0.01, %v1061_v32  ;;  %v1282_v39 = vsel %vm1154_vm12, %v1090_v46, %v1218_v36  ;;  %v1248_v42 = vsel %vm1120_vm13, %v1056_v47, %v1184_v37  ;;  %vm1157_vm0 = vcmp.ge.f32.partialorder %v1093_v33, 0.0  ;;  %v143_v46 = vld [vmem:[#allocation2 + $0x1c0] sm:$0xff]  ;;  %v114_v47 = vld [vmem:[#allocation2 + $0xd8] sm:$0xff]  ;;  %v144_v37 = vld [vmem:[#allocation2 + $0x1c8] sm:$0xff] }
 0x12e   :  { %v1221_v45 = vmul.f32 0.01, %v1093_v33  ;;  %v1801_v50 = vpack.c.bf16 %v1282_v39, %v1282_v39  ;;  %v1767_v54 = vpack.c.bf16 %v1248_v42, %v1248_v42  ;;  %v1280_v51 = vsel %vm1152_vm14, %v1088_v31, %v1216_v38  ;;  %v146_v31 = vld [vmem:[#allocation2 + $0x1d8] sm:$0xff] }
 0x12f   :  { %v1253_v56 = vsel %vm1125_vm15, %v1061_v32, %v1189_v62  ;;  %v1799_v61 = vpack.c.bf16 %v1280_v51, %v1280_v51  ;;  %v991_v7 = vmul.f32 %v2653_v26, %v920_v48  ;;  %v1023_v27 = vmul.f32 %v2653_v26, %v952_v49  ;;  %v112_v32 = vld [vmem:[#allocation2 + $0xc8] sm:$0xff]  ;;  %v149_v48 = vld [vmem:[#allocation2 + $0x1f0] sm:$0xff]  ;;  %v115_v49 = vld [vmem:[#allocation2 + $0xe0] sm:$0xff] }
 0x130   :  { %v1772_v59 = vpack.c.bf16 %v1253_v56, %v1253_v56  ;;  %v1285_v63 = vsel %vm1157_vm0, %v1093_v33, %v1221_v45  ;;  %1603 = vst.msk [vmem:[%s2837_s4 + $0xcc] sm:$0xf] %vm1551_vm2, %v1801_v50  ;;  %1569 = vst.msk [vmem:[%s2837_s4 + $0x44] sm:$0xf] %vm1551_vm2, %v1767_v54  ;;  %vm1123_vm3 = vcmp.ge.f32.partialorder %v1059_v0, 0.0  ;;  %v989_v10 = vmul.f32 %v2653_v26, %v918_v60  ;;  %v117_v45 = vld [vmem:[#allocation2 + $0xf0] sm:$0xff] }
 0x131   :  { %v1804_v2 = vpack.c.bf16 %v1285_v63, %v1285_v63  ;;  %1601 = vst.msk [vmem:[%s2837_s4 + $0xc4] sm:$0xf] %vm1551_vm2, %v1799_v61  ;;  %v1187_v8 = vmul.f32 0.01, %v1059_v0  ;;  %v1021_v11 = vmul.f32 %v2653_v26, %v950_v57  ;;  %vm1155_vm4 = vcmp.ge.f32.partialorder %v1091_v3, 0.0  ;;  %v147_v60 = vld [vmem:[#allocation2 + $0x1e0] sm:$0xff] }
 0x132   :  { %1574 = vst.msk [vmem:[%s2837_s4 + $0x58] sm:$0xf] %vm1551_vm2, %v1772_v59  ;;  %v1219_v12 = vmul.f32 0.01, %v1091_v3  ;;  %v1062_v44 = vadd.f32 %v2674_v41, %v991_v7  ;;  %v1094_v13 = vadd.f32 %v2674_v41, %v1023_v27  ;;  %v1060_v15 = vadd.f32 %v2674_v41, %v989_v10  ;;  %v118_v57 = vld [vmem:[#allocation2 + $0xf8] sm:$0xff] }
 0x133   :  { %1606 = vst.msk [vmem:[%s2837_s4 + $0xd8] sm:$0xf] %vm1551_vm2, %v1804_v2  ;;  %v1251_v14 = vsel %vm1123_vm3, %v1059_v0, %v1187_v8  ;;  %v1092_v16 = vadd.f32 %v2674_v41, %v1021_v11  ;;  %v792_v17 = vadd.f32 %v2482_v22, %v113_v34  ;;  %v824_v39 = vadd.f32 %v2484_v4, %v145_v18  ;;  %v150_v61 = vld [vmem:[#allocation2 + $0x1f8] sm:$0xff]  ;;  %v116_v0 = vld [vmem:[#allocation2 + $0xe8] sm:$0xff] }
 0x134   :  { %v1770_v19 = vpack.c.bf16 %v1251_v14, %v1251_v14  ;;  %v1283_v20 = vsel %vm1155_vm4, %v1091_v3, %v1219_v12  ;;  %vm1126_vm5 = vcmp.ge.f32.partialorder %v1062_v44, 0.0  ;;  %v1190_v24 = vmul.f32 0.01, %v1062_v44 }
 0x135   :  { %v1802_v29 = vpack.c.bf16 %v1283_v20, %v1283_v20  ;;  %vm1158_vm6 = vcmp.ge.f32.partialorder %v1094_v13, 0.0  ;;  %v1222_v30 = vmul.f32 0.01, %v1094_v13  ;;  %vm1124_vm7 = vcmp.ge.f32.partialorder %v1060_v15, 0.0  ;;  %856 = vst.msk [vmem:[#allocation2 + $0xd0] sm:$0xff] %vm22_vm1, %v792_v17  ;;  %888 = vst.msk [vmem:[#allocation2 + $0x1d0] sm:$0xff] %vm22_vm1, %v824_v39 }
 0x136   :  { %1572 = vst.msk [vmem:[%s2837_s4 + $0x50] sm:$0xf] %vm1551_vm2, %v1770_v19  ;;  %v1254_v22 = vsel %vm1126_vm5, %v1062_v44, %v1190_v24  ;;  %v1188_v33 = vmul.f32 0.01, %v1060_v15  ;;  %vm1156_vm8 = vcmp.ge.f32.partialorder %v1092_v16, 0.0  ;;  %v790_v42 = vadd.f32 %v2486_v40, %v111_v25 }
 0x137   :  { %v1220_v36 = vmul.f32 0.01, %v1092_v16  ;;  %1604 = vst.msk [vmem:[%s2837_s4 + $0xd0] sm:$0xf] %vm1551_vm2, %v1802_v29  ;;  %v1773_v38 = vpack.c.bf16 %v1254_v22, %v1254_v22  ;;  %v1286_v62 = vsel %vm1158_vm6, %v1094_v13, %v1222_v30  ;;  %v822_v56 = vadd.f32 %v2488_v9, %v143_v46  ;;  %v148_v9 = vld [vmem:[#allocation2 + $0x1e8] sm:$0xff] }
 0x138   :  { %v1805_v50 = vpack.c.bf16 %v1286_v62, %v1286_v62  ;;  %v1252_v54 = vsel %vm1124_vm7, %v1060_v15, %v1188_v33  ;;  %854 = vst.msk [vmem:[#allocation2 + $0xc0] sm:$0xff] %vm22_vm1, %v790_v42  ;;  %v793_v40 = vadd.f32 %v2505_v21, %v114_v47  ;;  %v825_v63 = vadd.f32 %v2507_v23, %v146_v31 }
 0x139   :  { %v1284_v51 = vsel %vm1156_vm8, %v1092_v16, %v1220_v36  ;;  %1575 = vst.msk [vmem:[%s2837_s4 + $0x5c] sm:$0xf] %vm1551_vm2, %v1773_v38  ;;  %v1771_v4 = vpack.c.bf16 %v1252_v54, %v1252_v54  ;;  %v791_v2 = vadd.f32 %v2510_v28, %v112_v32  ;;  %v823_v3 = vadd.f32 %v2512_v53, %v144_v37 }
 0x13a   :  { %v1803_v59 = vpack.c.bf16 %v1284_v51, %v1284_v51  ;;  %1607 = vst.msk [vmem:[%s2837_s4 + $0xdc] sm:$0xf] %vm1551_vm2, %v1805_v50  ;;  %v796_v7 = vadd.f32 %v2528_v43, %v117_v45  ;;  %v828_v27 = vadd.f32 %v2542_v52, %v149_v48  ;;  %v794_v21 = vadd.f32 %v2544_v55, %v115_v49 }
 0x13b   :  { %886 = vst.msk [vmem:[#allocation2 + $0x1c0] sm:$0xff] %vm22_vm1, %v822_v56  ;;  %857 = vst.msk [vmem:[#allocation2 + $0xd8] sm:$0xff] %vm22_vm1, %v793_v40  ;;  %v826_v23 = vadd.f32 %v2548_v58, %v147_v60  ;;  %v797_v28 = vadd.f32 %v2550_v5, %v118_v57  ;;  %v829_v53 = vadd.f32 %v2552_v1, %v150_v61 }
 0x13c   :  { %1573 = vst.msk [vmem:[%s2837_s4 + $0x54] sm:$0xf] %vm1551_vm2, %v1771_v4  ;;  %1605 = vst.msk [vmem:[%s2837_s4 + $0xd4] sm:$0xf] %vm1551_vm2, %v1803_v59  ;;  %v923_v43 = vld [vmem:[#allocation2 + $0xd0] sm:$0xff]  ;;  %v795_v52 = vadd.f32 %v2554_v6, %v116_v0  ;;  %v827_v34 = vadd.f32 %v2565_v35, %v148_v9 }
 0x13d   :  { %889 = vst.msk [vmem:[#allocation2 + $0x1d8] sm:$0xff] %vm22_vm1, %v825_v63  ;;  %855 = vst.msk [vmem:[#allocation2 + $0xc8] sm:$0xff] %vm22_vm1, %v791_v2  ;;  %v994_v55 = vmul.f32 %v2653_v26, %v923_v43  ;;  %v955_v5 = vld [vmem:[#allocation2 + $0x1d0] sm:$0xff] }
 0x13e   :  { %887 = vst.msk [vmem:[#allocation2 + $0x1c8] sm:$0xff] %vm22_vm1, %v823_v3  ;;  %860 = vst.msk [vmem:[#allocation2 + $0xf0] sm:$0xff] %vm22_vm1, %v796_v7  ;;  %v1026_v35 = vmul.f32 %v2653_v26, %v955_v5 }
 0x13f   :  { %892 = vst.msk [vmem:[#allocation2 + $0x1f0] sm:$0xff] %vm22_vm1, %v828_v27  ;;  %858 = vst.msk [vmem:[#allocation2 + $0xe0] sm:$0xff] %vm22_vm1, %v794_v21  ;;  %v1065_v58 = vadd.f32 %v2674_v41, %v994_v55  ;;  %v921_v1 = vld [vmem:[#allocation2 + $0xc0] sm:$0xff] }
 0x140   :  { %890 = vst.msk [vmem:[#allocation2 + $0x1e0] sm:$0xff] %vm22_vm1, %v826_v23  ;;  %861 = vst.msk [vmem:[#allocation2 + $0xf8] sm:$0xff] %vm22_vm1, %v797_v28  ;;  %v992_v8 = vmul.f32 %v2653_v26, %v921_v1  ;;  %v1097_v14 = vadd.f32 %v2674_v41, %v1026_v35 }
 0x141   :  { %893 = vst.msk [vmem:[#allocation2 + $0x1f8] sm:$0xff] %vm22_vm1, %v829_v53  ;;  %859 = vst.msk [vmem:[#allocation2 + $0xe8] sm:$0xff] %vm22_vm1, %v795_v52  ;;  %vm1129_vm9 = vcmp.ge.f32.partialorder %v1065_v58, 0.0  ;;  %v1193_v6 = vmul.f32 0.01, %v1065_v58 }
 0x142   :  { %891 = vst.msk [vmem:[#allocation2 + $0x1e8] sm:$0xff] %vm22_vm1, %v827_v34  ;;  %v953_v10 = vld [vmem:[#allocation2 + $0x1c0] sm:$0xff]  ;;  %v924_v12 = vld [vmem:[#allocation2 + $0xd8] sm:$0xff]  ;;  %v1063_v15 = vadd.f32 %v2674_v41, %v992_v8  ;;  %vm1161_vm1 = vcmp.ge.f32.partialorder %v1097_v14, 0.0  ;;  %v1225_v46 = vmul.f32 0.01, %v1097_v14 }
 0x143   :  { %v1024_v11 = vmul.f32 %v2653_v26, %v953_v10  ;;  %v1257_v13 = vsel %vm1129_vm9, %v1065_v58, %v1193_v6  ;;  %v995_v16 = vmul.f32 %v2653_v26, %v924_v12 }
 0x144   :  { %v956_v44 = vld [vmem:[#allocation2 + $0x1d8] sm:$0xff]  ;;  %v922_v17 = vld [vmem:[#allocation2 + $0xc8] sm:$0xff]  ;;  %v1776_v18 = vpack.c.bf16 %v1257_v13, %v1257_v13  ;;  %vm1127_vm10 = vcmp.ge.f32.partialorder %v1063_v15, 0.0  ;;  %v1191_v47 = vmul.f32 0.01, %v1063_v15  ;;  %v1289_v32 = vsel %vm1161_vm1, %v1097_v14, %v1225_v46 }
 0x145   :  { %v1095_v19 = vadd.f32 %v2674_v41, %v1024_v11  ;;  %v1027_v20 = vmul.f32 %v2653_v26, %v956_v44  ;;  %v993_v24 = vmul.f32 %v2653_v26, %v922_v17  ;;  %v954_v25 = vld [vmem:[#allocation2 + $0x1c8] sm:$0xff]  ;;  %v1066_v30 = vadd.f32 %v2674_v41, %v995_v16  ;;  %v927_v37 = vld [vmem:[#allocation2 + $0xf0] sm:$0xff] }
 0x146   :  { %1578 = vst.msk [vmem:[%s2837_s4 + $0x68] sm:$0xf] %vm1551_vm2, %v1776_v18  ;;  %v1255_v22 = vsel %vm1127_vm10, %v1063_v15, %v1191_v47  ;;  %v1025_v36 = vmul.f32 %v2653_v26, %v954_v25  ;;  %v1808_v38 = vpack.c.bf16 %v1289_v32, %v1289_v32  ;;  %v959_v42 = vld [vmem:[#allocation2 + $0x1f0] sm:$0xff]  ;;  %v925_v45 = vld [vmem:[#allocation2 + $0xe0] sm:$0xff]  ;;  %v998_v56 = vmul.f32 %v2653_v26, %v927_v37 }
 0x147   :  { %vm1159_vm11 = vcmp.ge.f32.partialorder %v1095_v19, 0.0  ;;  %v1223_v29 = vmul.f32 0.01, %v1095_v19  ;;  %v1098_v31 = vadd.f32 %v2674_v41, %v1027_v20  ;;  %v1064_v33 = vadd.f32 %v2674_v41, %v993_v24  ;;  %v957_v59 = vld [vmem:[#allocation2 + $0x1e0] sm:$0xff]  ;;  %v928_v40 = vld [vmem:[#allocation2 + $0xf8] sm:$0xff] }
 0x148   :  { %v1774_v62 = vpack.c.bf16 %v1255_v22, %v1255_v22  ;;  %vm1130_vm12 = vcmp.ge.f32.partialorder %v1066_v30, 0.0  ;;  %v1194_v49 = vmul.f32 0.01, %v1066_v30  ;;  %1610 = vst.msk [vmem:[%s2837_s4 + $0xe8] sm:$0xf] %vm1551_vm2, %v1808_v38  ;;  %v1096_v51 = vadd.f32 %v2674_v41, %v1025_v36  ;;  %v960_v63 = vld [vmem:[#allocation2 + $0x1f8] sm:$0xff] }
 0x149   :  { %v1287_v39 = vsel %vm1159_vm11, %v1095_v19, %v1223_v29  ;;  %vm1162_vm13 = vcmp.ge.f32.partialorder %v1098_v31, 0.0  ;;  %v1226_v50 = vmul.f32 0.01, %v1098_v31  ;;  %vm1128_vm14 = vcmp.ge.f32.partialorder %v1064_v33, 0.0  ;;  %v926_v55 = vld [vmem:[#allocation2 + $0xe8] sm:$0xff] }
 0x14a   :  { %v1806_v48 = vpack.c.bf16 %v1287_v39, %v1287_v39  ;;  %1576 = vst.msk [vmem:[%s2837_s4 + $0x60] sm:$0xf] %vm1551_vm2, %v1774_v62  ;;  %v1192_v54 = vmul.f32 0.01, %v1064_v33  ;;  %v1258_v60 = vsel %vm1130_vm12, %v1066_v30, %v1194_v49  ;;  %v1030_v61 = vmul.f32 %v2653_v26, %v959_v42  ;;  %v958_v14 = vld [vmem:[#allocation2 + $0x1e8] sm:$0xff] }
 0x14b   :  { %v1290_v57 = vsel %vm1162_vm13, %v1098_v31, %v1226_v50  ;;  %v996_v4 = vmul.f32 %v2653_v26, %v925_v45  ;;  %v1777_v0 = vpack.c.bf16 %v1258_v60, %v1258_v60  ;;  %vm1160_vm15 = vcmp.ge.f32.partialorder %v1096_v51, 0.0 }
 0x14c   :  { %1608 = vst.msk [vmem:[%s2837_s4 + $0xe0] sm:$0xf] %vm1551_vm2, %v1806_v48  ;;  %v1809_v9 = vpack.c.bf16 %v1290_v57, %v1290_v57  ;;  %v1256_v2 = vsel %vm1128_vm14, %v1064_v33, %v1192_v54  ;;  %v1224_v7 = vmul.f32 0.01, %v1096_v51  ;;  %v1069_v27 = vadd.f32 %v2674_v41, %v998_v56 }
 0x14d   :  { %v1775_v3 = vpack.c.bf16 %v1256_v2, %v1256_v2  ;;  %v1101_v21 = vadd.f32 %v2674_v41, %v1030_v61  ;;  %1579 = vst.msk [vmem:[%s2837_s4 + $0x6c] sm:$0xf] %vm1551_vm2, %v1777_v0  ;;  %v1067_v23 = vadd.f32 %v2674_v41, %v996_v4  ;;  %v1028_v28 = vmul.f32 %v2653_v26, %v957_v59 }
 0x14e   :  { %1611 = vst.msk [vmem:[%s2837_s4 + $0xec] sm:$0xf] %vm1551_vm2, %v1809_v9  ;;  %v999_v53 = vmul.f32 %v2653_v26, %v928_v40  ;;  %v1031_v43 = vmul.f32 %v2653_v26, %v960_v63  ;;  %v1288_v52 = vsel %vm1160_vm15, %v1096_v51, %v1224_v7  ;;  %vm1133_vm0 = vcmp.ge.f32.partialorder %v1069_v27, 0.0 }
 0x14f   :  { %1577 = vst.msk [vmem:[%s2837_s4 + $0x64] sm:$0xf] %vm1551_vm2, %v1775_v3  ;;  %v1197_v34 = vmul.f32 0.01, %v1069_v27  ;;  %vm1165_vm3 = vcmp.ge.f32.partialorder %v1101_v21, 0.0  ;;  %v1807_v58 = vpack.c.bf16 %v1288_v52, %v1288_v52  ;;  %vm1131_vm4 = vcmp.ge.f32.partialorder %v1067_v23, 0.0 }
 0x150   :  { %v1229_v5 = vmul.f32 0.01, %v1101_v21  ;;  %v1195_v1 = vmul.f32 0.01, %v1067_v23  ;;  %v1099_v35 = vadd.f32 %v2674_v41, %v1028_v28  ;;  %v1070_v8 = vadd.f32 %v2674_v41, %v999_v53 }
 0x151   :  { %v1261_v6 = vsel %vm1133_vm0, %v1069_v27, %v1197_v34  ;;  %v1102_v10 = vadd.f32 %v2674_v41, %v1031_v43  ;;  %1609 = vst.msk [vmem:[%s2837_s4 + $0xe4] sm:$0xf] %vm1551_vm2, %v1807_v58  ;;  %v997_v13 = vmul.f32 %v2653_v26, %v926_v55  ;;  %v1029_v25 = vmul.f32 %v2653_v26, %v958_v14 }
 0x152   :  { %v1780_v11 = vpack.c.bf16 %v1261_v6, %v1261_v6  ;;  %v1293_v12 = vsel %vm1165_vm3, %v1101_v21, %v1229_v5  ;;  %v1259_v44 = vsel %vm1131_vm4, %v1067_v23, %v1195_v1  ;;  %vm1163_vm5 = vcmp.ge.f32.partialorder %v1099_v35, 0.0 }
 0x153   :  { %v1812_v15 = vpack.c.bf16 %v1293_v12, %v1293_v12  ;;  %v1778_v16 = vpack.c.bf16 %v1259_v44, %v1259_v44  ;;  %v1227_v17 = vmul.f32 0.01, %v1099_v35  ;;  %vm1134_vm6 = vcmp.ge.f32.partialorder %v1070_v8, 0.0 }
 0x154   :  { %1582 = vst.msk [vmem:[%s2837_s4 + $0x78] sm:$0xf] %vm1551_vm2, %v1780_v11  ;;  %v1198_v18 = vmul.f32 0.01, %v1070_v8  ;;  %vm1166_vm7 = vcmp.ge.f32.partialorder %v1102_v10, 0.0  ;;  %v1068_v24 = vadd.f32 %v2674_v41, %v997_v13  ;;  %v1100_v22 = vadd.f32 %v2674_v41, %v1029_v25 }
 0x155   :  { %v1230_v19 = vmul.f32 0.01, %v1102_v10  ;;  %1614 = vst.msk [vmem:[%s2837_s4 + $0xf8] sm:$0xf] %vm1551_vm2, %v1812_v15  ;;  %1580 = vst.msk [vmem:[%s2837_s4 + $0x70] sm:$0xf] %vm1551_vm2, %v1778_v16  ;;  %v1291_v20 = vsel %vm1163_vm5, %v1099_v35, %v1227_v17 }
 0x156   :  { %v1810_v46 = vpack.c.bf16 %v1291_v20, %v1291_v20  ;;  %v1262_v47 = vsel %vm1134_vm6, %v1070_v8, %v1198_v18  ;;  %vm1132_vm8 = vcmp.ge.f32.partialorder %v1068_v24, 0.0  ;;  %v1196_v32 = vmul.f32 0.01, %v1068_v24 }
 0x157   :  { %v1294_v29 = vsel %vm1166_vm7, %v1102_v10, %v1230_v19  ;;  %v1781_v30 = vpack.c.bf16 %v1262_v47, %v1262_v47  ;;  %vm1164_vm9 = vcmp.ge.f32.partialorder %v1100_v22, 0.0  ;;  %v1228_v36 = vmul.f32 0.01, %v1100_v22 }
 0x158   :  { %v1813_v31 = vpack.c.bf16 %v1294_v29, %v1294_v29  ;;  %1612 = vst.msk [vmem:[%s2837_s4 + $0xf0] sm:$0xf] %vm1551_vm2, %v1810_v46  ;;  %v1260_v26 = vsel %vm1132_vm8, %v1068_v24, %v1196_v32 }
 0x159   :  { %1583 = vst.msk [vmem:[%s2837_s4 + $0x7c] sm:$0xf] %vm1551_vm2, %v1781_v30  ;;  %v1779_v33 = vpack.c.bf16 %v1260_v26, %v1260_v26  ;;  %v1292_v41 = vsel %vm1164_vm9, %v1100_v22, %v1228_v36 }
 0x15a   :  { %1615 = vst.msk [vmem:[%s2837_s4 + $0xfc] sm:$0xf] %vm1551_vm2, %v1813_v31  ;;  %v1811_v37 = vpack.c.bf16 %v1292_v41, %v1292_v41 }
 0x15b   :  { %1581 = vst.msk [vmem:[%s2837_s4 + $0x74] sm:$0xf] %vm1551_vm2, %v1779_v33 }
 0x15c   :  { %1613 = vst.msk [vmem:[%s2837_s4 + $0xf4] sm:$0xf] %vm1551_vm2, %v1811_v37 }

</bundles_post_ra>
